<compile_context>
chip_gen: v7x
topology: tpu7x:2x2x1
jax: 0.10.0
libtpu: 0.0.40
codegen_flags: <defaults>
</compile_context>

<pallas_src>
import jax
import jax.numpy as jnp
from jax import lax
from jax.experimental import pallas as pl
from jax.experimental.pallas import tpu as pltpu

C = 16      # feature channels of original / sampled features
K = 10      # number of sampled candidates per position
TOPK = 4    # neighbors kept


def _round_up(x, m):
    return (x + m - 1) // m * m


def _similarity_kernel(orig_ref, samp_ref, w_ref, b_ref, out_ref):
    # orig_ref : (1, C, TE)       samp_ref : (1, K, C, TE)
    # w_ref    : (C, 4)  VMEM     b_ref    : (2,)  SMEM  [b1, b2]
    orig = orig_ref[0].astype(jnp.float32)            # (C, TE)
    w = w_ref[...].astype(jnp.float32)                 # (C, 4)
    w1a = w[:, 0:1]                                    # conv-1 weights, original channels
    w1b = w[:, 1:2]                                    # conv-1 weights, sampled channels
    w2a = w[:, 2:3]                                    # conv-2 weights, original channels
    w2b = w[:, 3:4]                                    # conv-2 weights, sampled channels
    b1 = b_ref[0]
    b2 = b_ref[1]

    Kk = samp_ref.shape[1]
    TE = orig.shape[-1]

    # --- channel reductions over the original tile (shared across all k) -----
    s_orig = jnp.sum(orig * w1a, axis=0, keepdims=True)             # (1, TE)
    r_orig = jnp.sum(orig * w2a, axis=0, keepdims=True)             # (1, TE)

    # --- pass 1 over the big operand: per-k channel reductions, streamed -----
    s_rows, t_rows = [], []
    for k in range(Kk):                                             # static unroll
        sk = samp_ref[0, k].astype(jnp.float32)                     # (C, TE)
        s_rows.append(jnp.sum(sk * w1b, axis=0, keepdims=True))     # (1, TE)
        t_rows.append(jnp.sum(sk * w2b, axis=0, keepdims=True))     # (1, TE)
    s_samp = jnp.concatenate(s_rows, axis=0)                        # (K, TE)
    t2 = jnp.concatenate(t_rows, axis=0)                            # (K, TE)

    sim = jax.nn.sigmoid(s_samp + s_orig + b1)                      # (K, TE)

    # --- top-4 selection: only (K, TE)-sized work inside the loop ------------
    k_iota = lax.broadcasted_iota(jnp.int32, (Kk, TE), 0)
    wk = jnp.zeros((Kk, TE), jnp.float32)                           # combined per-k weights
    cur = sim
    for _ in range(TOPK):
        m = jnp.max(cur, axis=0, keepdims=True)                     # (1, TE)
        cand = jnp.where(cur == m, k_iota, Kk)
        idx = jnp.min(cand, axis=0, keepdims=True)                  # (1, TE)
        onehot = k_iota == idx                                      # (K, TE) bool
        onef = onehot.astype(jnp.float32)

        # per-neighbor recalc weight: masked K-reduction of the hoisted t2
        t2_sel = jnp.sum(onef * t2, axis=0, keepdims=True)          # (1, TE)
        r = jax.nn.sigmoid(r_orig + t2_sel + b2)                    # (1, TE)

        wk = wk + onef * r
        cur = jnp.where(onehot, -jnp.inf, cur)                      # remove selected

    # --- pass 2 over the big operand: weighted sum over K (+ original) -------
    acc = orig                                                      # (C, TE) f32
    for k in range(Kk):
        acc = acc + samp_ref[0, k].astype(jnp.float32) * wk[k:k + 1, :]

    out_ref[0] = acc.astype(out_ref.dtype)


def similarity_weight_generator(original_features, sampled_features, params, *, tile_e=1024):
    """original_features: (B, C, E) ; sampled_features: (B, C, E, K) (PyTorch layout)."""
    B, C_, E = original_features.shape
    K_ = sampled_features.shape[-1]

    # Pack the 1x1-conv weights: columns = [w1_orig, w1_samp, w2_orig, w2_samp].
    w1 = params["conv_w"].reshape(2 * C_).astype(jnp.float32)
    w2 = params["recalc_w"].reshape(2 * C_).astype(jnp.float32)
    w_packed = jnp.stack([w1[:C_], w1[C_:], w2[:C_], w2[C_:]], axis=1)      # (C, 4)
    biases = jnp.concatenate(
        [params["conv_b"].reshape(1), params["recalc_b"].reshape(1)]
    ).astype(jnp.float32)                                                    # (2,)

    # K-leading layout: (B, K, C, E) keeps the (C, E) = (16, TE) tile (8,128)-aligned.
    # TODO(synk): produce sampled_features directly in (B, K, C, E) upstream so this
    #             extra HBM pass over the dominant tensor disappears entirely.
    samp_t = jnp.transpose(sampled_features, (0, 3, 1, 2))                   # (B, K, C, E)

    # E tiling: multiple of 128, bounded working set, padded if needed.
    te = min(tile_e, _round_up(E, 128))
    te = _round_up(te, 128)
    Ep = _round_up(E, te)
    if Ep != E:
        pad = Ep - E
        orig_p = jnp.pad(original_features, ((0, 0), (0, 0), (0, pad)))
        samp_p = jnp.pad(samp_t, ((0, 0), (0, 0), (0, 0), (0, pad)))
    else:
        orig_p = original_features
        samp_p = samp_t

    out = pl.pallas_call(
        _similarity_kernel,
        out_shape=jax.ShapeDtypeStruct((B, C_, Ep), original_features.dtype),
        grid_spec=pl.GridSpec(
            grid=(B, Ep // te),
            in_specs=[
                pl.BlockSpec((1, C_, te), lambda b, e: (b, 0, e)),
                pl.BlockSpec((1, K_, C_, te), lambda b, e: (b, 0, 0, e)),
                pl.BlockSpec((C_, 4), lambda b, e: (0, 0)),                  # resident weights
                pl.BlockSpec(memory_space=pltpu.MemorySpace.SMEM),           # biases in SMEM
            ],
            out_specs=pl.BlockSpec((1, C_, te), lambda b, e: (b, 0, e)),
        ),
        compiler_params=pltpu.CompilerParams(
            dimension_semantics=("parallel", "parallel")),
    )(orig_p, samp_p, w_packed, biases)

    return out[:, :, :E] if Ep != E else out


def reference(original_features, sampled_features, params):
    """Pure-JAX mirror of the PyTorch forward (for validation)."""
    B, C_, E = original_features.shape
    K_ = sampled_features.shape[-1]
    w1 = params["conv_w"].reshape(2 * C_)
    w2 = params["recalc_w"].reshape(2 * C_)
    b1 = params["conv_b"][0]
    b2 = params["recalc_b"][0]

    rep = jnp.repeat(original_features[..., None], K_, axis=-1)        # (B,C,E,K)
    cat = jnp.concatenate([rep, sampled_features], axis=1)             # (B,2C,E,K)
    sim = jax.nn.sigmoid(jnp.einsum('bcek,c->bek', cat, w1) + b1)      # (B,E,K)
    _, idx = lax.top_k(sim, TOPK)                                      # (B,E,4)
    idx_e = jnp.broadcast_to(idx[:, None, :, :], (B, C_, E, TOPK))
    topk_feat = jnp.take_along_axis(sampled_features, idx_e, axis=-1)  # (B,C,E,4)
    orig_exp = jnp.broadcast_to(original_features[..., None], (B, C_, E, TOPK))
    cat2 = jnp.concatenate([orig_exp, topk_feat], axis=1)              # (B,2C,E,4)
    rw = jax.nn.sigmoid(jnp.einsum('bcek,c->bek', cat2, w2) + b2)      # (B,E,4)
    weighted = topk_feat * rw[:, None, :, :]
    return original_features + weighted.sum(-1)


if __name__ == "__main__":
    key = jax.random.PRNGKey(0)
    k1, k2, k3, k4 = jax.random.split(key, 4)

    B, E = 2, 512
    original = jax.random.normal(k1, (B, C, E), jnp.float32)
    sampled = jax.random.normal(k2, (B, C, E, K), jnp.float32)

    # deterministic synthetic parameters (Conv2d(32,1,1x1) weights + biases)
    params = {
        "conv_w": 0.1 * jax.random.normal(k3, (1, 2 * C, 1, 1), jnp.float32),
        "conv_b": jnp.full((1,), 0.05, jnp.float32),
        "recalc_w": 0.1 * jax.random.normal(k4, (1, 2 * C, 1, 1), jnp.float32),
        "recalc_b": jnp.full((1,), -0.05, jnp.float32),
    }

    # tile_e=256 -> grid (B, 2): exercises the E-tiled, multi-step pipeline.
    out = similarity_weight_generator(original, sampled, params, tile_e=256)
    out = jax.block_until_ready(out)

    ref = reference(original, sampled, params)
    assert out.shape == (B, C, E), out.shape
    assert jnp.allclose(out, ref, atol=1e-4, rtol=1e-4), float(jnp.max(jnp.abs(out - ref)))
    print("KERNEL_OK")
</pallas_src>

<mosaic_0001>
module attributes {stable_mosaic.version = 11 : i64} {
  func.func @_similarity_kernel(%arg0: i32, %arg1: i32, %arg2: memref<1x16x256xf32, #tpu.memory_space<vmem>>, %arg3: memref<1x10x16x256xf32, #tpu.memory_space<vmem>>, %arg4: memref<16x4xf32, #tpu.memory_space<vmem>>, %arg5: memref<2xf32, #tpu.memory_space<smem>>, %arg6: memref<1x16x256xf32, #tpu.memory_space<vmem>>) attributes {dimension_semantics = [#tpu.dimension_semantics<parallel>, #tpu.dimension_semantics<parallel>], iteration_bounds = array<i64: 2, 2>, scalar_prefetch = 0 : i64, scratch_operands = 0 : i64, tpu.core_type = #tpu.core_type<tc>, window_params = [{transform_indices = @transform_0, window_bounds = array<i64: 1, 16, 256>}, {transform_indices = @transform_1, window_bounds = array<i64: 1, 10, 16, 256>}, {pipeline_mode = #tpu.pipeline_mode<synchronous>, transform_indices = @transform_2, window_bounds = array<i64: 16, 4>}, {transform_indices = @transform_3, window_bounds = array<i64: 2>}, {transform_indices = @transform_4, window_bounds = array<i64: 1, 16, 256>}]} {
    %c0 = arith.constant 0 : index
    %c0_0 = arith.constant 0 : index
    %c0_1 = arith.constant 0 : index
    %0 = vector.load %arg2[%c0, %c0_0, %c0_1] : memref<1x16x256xf32, #tpu.memory_space<vmem>>, vector<1x16x256xf32>
    %1 = vector.shape_cast %0 : vector<1x16x256xf32> to vector<16x256xf32>
    %c0_2 = arith.constant 0 : index
    %c0_3 = arith.constant 0 : index
    %2 = vector.load %arg4[%c0_2, %c0_3] : memref<16x4xf32, #tpu.memory_space<vmem>>, vector<16x4xf32>
    %3 = vector.extract_strided_slice %2 {offsets = [0, 0], sizes = [16, 1], strides = [1, 1]} : vector<16x4xf32> to vector<16x1xf32>
    %4 = vector.extract_strided_slice %2 {offsets = [0, 1], sizes = [16, 1], strides = [1, 1]} : vector<16x4xf32> to vector<16x1xf32>
    %5 = vector.extract_strided_slice %2 {offsets = [0, 2], sizes = [16, 1], strides = [1, 1]} : vector<16x4xf32> to vector<16x1xf32>
    %6 = vector.extract_strided_slice %2 {offsets = [0, 3], sizes = [16, 1], strides = [1, 1]} : vector<16x4xf32> to vector<16x1xf32>
    %c0_4 = arith.constant 0 : index
    %7 = memref.load %arg5[%c0_4] : memref<2xf32, #tpu.memory_space<smem>>
    %c1 = arith.constant 1 : index
    %8 = memref.load %arg5[%c1] : memref<2xf32, #tpu.memory_space<smem>>
    %9 = vector.broadcast %3 : vector<16x1xf32> to vector<16x256xf32>
    %10 = arith.mulf %1, %9 : vector<16x256xf32>
    %cst = arith.constant dense<0.000000e+00> : vector<256xf32>
    %11 = vector.multi_reduction <add>, %10, %cst [0] : vector<16x256xf32> to vector<256xf32>
    %12 = vector.shape_cast %11 : vector<256xf32> to vector<1x256xf32>
    %13 = vector.broadcast %5 : vector<16x1xf32> to vector<16x256xf32>
    %14 = arith.mulf %1, %13 : vector<16x256xf32>
    %cst_5 = arith.constant dense<0.000000e+00> : vector<256xf32>
    %15 = vector.multi_reduction <add>, %14, %cst_5 [0] : vector<16x256xf32> to vector<256xf32>
    %16 = vector.shape_cast %15 : vector<256xf32> to vector<1x256xf32>
    %c0_6 = arith.constant 0 : index
    %c0_7 = arith.constant 0 : index
    %c0_8 = arith.constant 0 : index
    %c0_9 = arith.constant 0 : index
    %17 = vector.load %arg3[%c0_6, %c0_7, %c0_8, %c0_9] : memref<1x10x16x256xf32, #tpu.memory_space<vmem>>, vector<1x1x16x256xf32>
    %18 = vector.shape_cast %17 : vector<1x1x16x256xf32> to vector<16x256xf32>
    %19 = vector.broadcast %4 : vector<16x1xf32> to vector<16x256xf32>
    %20 = arith.mulf %18, %19 : vector<16x256xf32>
    %cst_10 = arith.constant dense<0.000000e+00> : vector<256xf32>
    %21 = vector.multi_reduction <add>, %20, %cst_10 [0] : vector<16x256xf32> to vector<256xf32>
    %22 = vector.shape_cast %21 : vector<256xf32> to vector<1x256xf32>
    %23 = vector.broadcast %6 : vector<16x1xf32> to vector<16x256xf32>
    %24 = arith.mulf %18, %23 : vector<16x256xf32>
    %cst_11 = arith.constant dense<0.000000e+00> : vector<256xf32>
    %25 = vector.multi_reduction <add>, %24, %cst_11 [0] : vector<16x256xf32> to vector<256xf32>
    %26 = vector.shape_cast %25 : vector<256xf32> to vector<1x256xf32>
    %c0_12 = arith.constant 0 : index
    %c1_13 = arith.constant 1 : index
    %c0_14 = arith.constant 0 : index
    %c0_15 = arith.constant 0 : index
    %27 = vector.load %arg3[%c0_12, %c1_13, %c0_14, %c0_15] : memref<1x10x16x256xf32, #tpu.memory_space<vmem>>, vector<1x1x16x256xf32>
    %28 = vector.shape_cast %27 : vector<1x1x16x256xf32> to vector<16x256xf32>
    %29 = vector.broadcast %4 : vector<16x1xf32> to vector<16x256xf32>
    %30 = arith.mulf %28, %29 : vector<16x256xf32>
    %cst_16 = arith.constant dense<0.000000e+00> : vector<256xf32>
    %31 = vector.multi_reduction <add>, %30, %cst_16 [0] : vector<16x256xf32> to vector<256xf32>
    %32 = vector.shape_cast %31 : vector<256xf32> to vector<1x256xf32>
    %33 = vector.broadcast %6 : vector<16x1xf32> to vector<16x256xf32>
    %34 = arith.mulf %28, %33 : vector<16x256xf32>
    %cst_17 = arith.constant dense<0.000000e+00> : vector<256xf32>
    %35 = vector.multi_reduction <add>, %34, %cst_17 [0] : vector<16x256xf32> to vector<256xf32>
    %36 = vector.shape_cast %35 : vector<256xf32> to vector<1x256xf32>
    %c0_18 = arith.constant 0 : index
    %c2 = arith.constant 2 : index
    %c0_19 = arith.constant 0 : index
    %c0_20 = arith.constant 0 : index
    %37 = vector.load %arg3[%c0_18, %c2, %c0_19, %c0_20] : memref<1x10x16x256xf32, #tpu.memory_space<vmem>>, vector<1x1x16x256xf32>
    %38 = vector.shape_cast %37 : vector<1x1x16x256xf32> to vector<16x256xf32>
    %39 = vector.broadcast %4 : vector<16x1xf32> to vector<16x256xf32>
    %40 = arith.mulf %38, %39 : vector<16x256xf32>
    %cst_21 = arith.constant dense<0.000000e+00> : vector<256xf32>
    %41 = vector.multi_reduction <add>, %40, %cst_21 [0] : vector<16x256xf32> to vector<256xf32>
    %42 = vector.shape_cast %41 : vector<256xf32> to vector<1x256xf32>
    %43 = vector.broadcast %6 : vector<16x1xf32> to vector<16x256xf32>
    %44 = arith.mulf %38, %43 : vector<16x256xf32>
    %cst_22 = arith.constant dense<0.000000e+00> : vector<256xf32>
    %45 = vector.multi_reduction <add>, %44, %cst_22 [0] : vector<16x256xf32> to vector<256xf32>
    %46 = vector.shape_cast %45 : vector<256xf32> to vector<1x256xf32>
    %c0_23 = arith.constant 0 : index
    %c3 = arith.constant 3 : index
    %c0_24 = arith.constant 0 : index
    %c0_25 = arith.constant 0 : index
    %47 = vector.load %arg3[%c0_23, %c3, %c0_24, %c0_25] : memref<1x10x16x256xf32, #tpu.memory_space<vmem>>, vector<1x1x16x256xf32>
    %48 = vector.shape_cast %47 : vector<1x1x16x256xf32> to vector<16x256xf32>
    %49 = vector.broadcast %4 : vector<16x1xf32> to vector<16x256xf32>
    %50 = arith.mulf %48, %49 : vector<16x256xf32>
    %cst_26 = arith.constant dense<0.000000e+00> : vector<256xf32>
    %51 = vector.multi_reduction <add>, %50, %cst_26 [0] : vector<16x256xf32> to vector<256xf32>
    %52 = vector.shape_cast %51 : vector<256xf32> to vector<1x256xf32>
    %53 = vector.broadcast %6 : vector<16x1xf32> to vector<16x256xf32>
    %54 = arith.mulf %48, %53 : vector<16x256xf32>
    %cst_27 = arith.constant dense<0.000000e+00> : vector<256xf32>
    %55 = vector.multi_reduction <add>, %54, %cst_27 [0] : vector<16x256xf32> to vector<256xf32>
    %56 = vector.shape_cast %55 : vector<256xf32> to vector<1x256xf32>
    %c0_28 = arith.constant 0 : index
    %c4 = arith.constant 4 : index
    %c0_29 = arith.constant 0 : index
    %c0_30 = arith.constant 0 : index
    %57 = vector.load %arg3[%c0_28, %c4, %c0_29, %c0_30] : memref<1x10x16x256xf32, #tpu.memory_space<vmem>>, vector<1x1x16x256xf32>
    %58 = vector.shape_cast %57 : vector<1x1x16x256xf32> to vector<16x256xf32>
    %59 = vector.broadcast %4 : vector<16x1xf32> to vector<16x256xf32>
    %60 = arith.mulf %58, %59 : vector<16x256xf32>
    %cst_31 = arith.constant dense<0.000000e+00> : vector<256xf32>
    %61 = vector.multi_reduction <add>, %60, %cst_31 [0] : vector<16x256xf32> to vector<256xf32>
    %62 = vector.shape_cast %61 : vector<256xf32> to vector<1x256xf32>
    %63 = vector.broadcast %6 : vector<16x1xf32> to vector<16x256xf32>
    %64 = arith.mulf %58, %63 : vector<16x256xf32>
    %cst_32 = arith.constant dense<0.000000e+00> : vector<256xf32>
    %65 = vector.multi_reduction <add>, %64, %cst_32 [0] : vector<16x256xf32> to vector<256xf32>
    %66 = vector.shape_cast %65 : vector<256xf32> to vector<1x256xf32>
    %c0_33 = arith.constant 0 : index
    %c5 = arith.constant 5 : index
    %c0_34 = arith.constant 0 : index
    %c0_35 = arith.constant 0 : index
    %67 = vector.load %arg3[%c0_33, %c5, %c0_34, %c0_35] : memref<1x10x16x256xf32, #tpu.memory_space<vmem>>, vector<1x1x16x256xf32>
    %68 = vector.shape_cast %67 : vector<1x1x16x256xf32> to vector<16x256xf32>
    %69 = vector.broadcast %4 : vector<16x1xf32> to vector<16x256xf32>
    %70 = arith.mulf %68, %69 : vector<16x256xf32>
    %cst_36 = arith.constant dense<0.000000e+00> : vector<256xf32>
    %71 = vector.multi_reduction <add>, %70, %cst_36 [0] : vector<16x256xf32> to vector<256xf32>
    %72 = vector.shape_cast %71 : vector<256xf32> to vector<1x256xf32>
    %73 = vector.broadcast %6 : vector<16x1xf32> to vector<16x256xf32>
    %74 = arith.mulf %68, %73 : vector<16x256xf32>
    %cst_37 = arith.constant dense<0.000000e+00> : vector<256xf32>
    %75 = vector.multi_reduction <add>, %74, %cst_37 [0] : vector<16x256xf32> to vector<256xf32>
    %76 = vector.shape_cast %75 : vector<256xf32> to vector<1x256xf32>
    %c0_38 = arith.constant 0 : index
    %c6 = arith.constant 6 : index
    %c0_39 = arith.constant 0 : index
    %c0_40 = arith.constant 0 : index
    %77 = vector.load %arg3[%c0_38, %c6, %c0_39, %c0_40] : memref<1x10x16x256xf32, #tpu.memory_space<vmem>>, vector<1x1x16x256xf32>
    %78 = vector.shape_cast %77 : vector<1x1x16x256xf32> to vector<16x256xf32>
    %79 = vector.broadcast %4 : vector<16x1xf32> to vector<16x256xf32>
    %80 = arith.mulf %78, %79 : vector<16x256xf32>
    %cst_41 = arith.constant dense<0.000000e+00> : vector<256xf32>
    %81 = vector.multi_reduction <add>, %80, %cst_41 [0] : vector<16x256xf32> to vector<256xf32>
    %82 = vector.shape_cast %81 : vector<256xf32> to vector<1x256xf32>
    %83 = vector.broadcast %6 : vector<16x1xf32> to vector<16x256xf32>
    %84 = arith.mulf %78, %83 : vector<16x256xf32>
    %cst_42 = arith.constant dense<0.000000e+00> : vector<256xf32>
    %85 = vector.multi_reduction <add>, %84, %cst_42 [0] : vector<16x256xf32> to vector<256xf32>
    %86 = vector.shape_cast %85 : vector<256xf32> to vector<1x256xf32>
    %c0_43 = arith.constant 0 : index
    %c7 = arith.constant 7 : index
    %c0_44 = arith.constant 0 : index
    %c0_45 = arith.constant 0 : index
    %87 = vector.load %arg3[%c0_43, %c7, %c0_44, %c0_45] : memref<1x10x16x256xf32, #tpu.memory_space<vmem>>, vector<1x1x16x256xf32>
    %88 = vector.shape_cast %87 : vector<1x1x16x256xf32> to vector<16x256xf32>
    %89 = vector.broadcast %4 : vector<16x1xf32> to vector<16x256xf32>
    %90 = arith.mulf %88, %89 : vector<16x256xf32>
    %cst_46 = arith.constant dense<0.000000e+00> : vector<256xf32>
    %91 = vector.multi_reduction <add>, %90, %cst_46 [0] : vector<16x256xf32> to vector<256xf32>
    %92 = vector.shape_cast %91 : vector<256xf32> to vector<1x256xf32>
    %93 = vector.broadcast %6 : vector<16x1xf32> to vector<16x256xf32>
    %94 = arith.mulf %88, %93 : vector<16x256xf32>
    %cst_47 = arith.constant dense<0.000000e+00> : vector<256xf32>
    %95 = vector.multi_reduction <add>, %94, %cst_47 [0] : vector<16x256xf32> to vector<256xf32>
    %96 = vector.shape_cast %95 : vector<256xf32> to vector<1x256xf32>
    %c0_48 = arith.constant 0 : index
    %c8 = arith.constant 8 : index
    %c0_49 = arith.constant 0 : index
    %c0_50 = arith.constant 0 : index
    %97 = vector.load %arg3[%c0_48, %c8, %c0_49, %c0_50] : memref<1x10x16x256xf32, #tpu.memory_space<vmem>>, vector<1x1x16x256xf32>
    %98 = vector.shape_cast %97 : vector<1x1x16x256xf32> to vector<16x256xf32>
    %99 = vector.broadcast %4 : vector<16x1xf32> to vector<16x256xf32>
    %100 = arith.mulf %98, %99 : vector<16x256xf32>
    %cst_51 = arith.constant dense<0.000000e+00> : vector<256xf32>
    %101 = vector.multi_reduction <add>, %100, %cst_51 [0] : vector<16x256xf32> to vector<256xf32>
    %102 = vector.shape_cast %101 : vector<256xf32> to vector<1x256xf32>
    %103 = vector.broadcast %6 : vector<16x1xf32> to vector<16x256xf32>
    %104 = arith.mulf %98, %103 : vector<16x256xf32>
    %cst_52 = arith.constant dense<0.000000e+00> : vector<256xf32>
    %105 = vector.multi_reduction <add>, %104, %cst_52 [0] : vector<16x256xf32> to vector<256xf32>
    %106 = vector.shape_cast %105 : vector<256xf32> to vector<1x256xf32>
    %c0_53 = arith.constant 0 : index
    %c9 = arith.constant 9 : index
    %c0_54 = arith.constant 0 : index
    %c0_55 = arith.constant 0 : index
    %107 = vector.load %arg3[%c0_53, %c9, %c0_54, %c0_55] : memref<1x10x16x256xf32, #tpu.memory_space<vmem>>, vector<1x1x16x256xf32>
    %108 = vector.shape_cast %107 : vector<1x1x16x256xf32> to vector<16x256xf32>
    %109 = vector.broadcast %4 : vector<16x1xf32> to vector<16x256xf32>
    %110 = arith.mulf %108, %109 : vector<16x256xf32>
    %cst_56 = arith.constant dense<0.000000e+00> : vector<256xf32>
    %111 = vector.multi_reduction <add>, %110, %cst_56 [0] : vector<16x256xf32> to vector<256xf32>
    %112 = vector.shape_cast %111 : vector<256xf32> to vector<1x256xf32>
    %113 = vector.broadcast %6 : vector<16x1xf32> to vector<16x256xf32>
    %114 = arith.mulf %108, %113 : vector<16x256xf32>
    %cst_57 = arith.constant dense<0.000000e+00> : vector<256xf32>
    %115 = vector.multi_reduction <add>, %114, %cst_57 [0] : vector<16x256xf32> to vector<256xf32>
    %116 = vector.shape_cast %115 : vector<256xf32> to vector<1x256xf32>
    %117 = tpu.concatenate %22, %32, %42, %52, %62, %72, %82, %92, %102, %112 in 0 : vector<1x256xf32>, vector<1x256xf32>, vector<1x256xf32>, vector<1x256xf32>, vector<1x256xf32>, vector<1x256xf32>, vector<1x256xf32>, vector<1x256xf32>, vector<1x256xf32>, vector<1x256xf32> -> vector<10x256xf32>
    %118 = tpu.concatenate %26, %36, %46, %56, %66, %76, %86, %96, %106, %116 in 0 : vector<1x256xf32>, vector<1x256xf32>, vector<1x256xf32>, vector<1x256xf32>, vector<1x256xf32>, vector<1x256xf32>, vector<1x256xf32>, vector<1x256xf32>, vector<1x256xf32>, vector<1x256xf32> -> vector<10x256xf32>
    %119 = vector.broadcast %12 : vector<1x256xf32> to vector<10x256xf32>
    %120 = arith.addf %117, %119 : vector<10x256xf32>
    %121 = vector.broadcast %7 : f32 to vector<10x256xf32>
    %122 = arith.addf %120, %121 : vector<10x256xf32>
    %123 = arith.negf %122 : vector<10x256xf32>
    %124 = math.exp %123 : vector<10x256xf32>
    %cst_58 = arith.constant 1.000000e+00 : f32
    %125 = vector.broadcast %cst_58 : f32 to vector<10x256xf32>
    %126 = arith.addf %125, %124 : vector<10x256xf32>
    %127 = arith.divf %125, %126 : vector<10x256xf32>
    %128 = tpu.iota {dimensions = array<i32: 0>} : vector<10x256xi32>
    %cst_59 = arith.constant 0.000000e+00 : f32
    %129 = vector.broadcast %cst_59 : f32 to vector<10x256xf32>
    %cst_60 = arith.constant dense<0xFF800000> : vector<256xf32>
    %130 = vector.multi_reduction <maximumf>, %127, %cst_60 [0] : vector<10x256xf32> to vector<256xf32>
    %131 = vector.shape_cast %130 : vector<256xf32> to vector<1x256xf32>
    %132 = vector.broadcast %131 : vector<1x256xf32> to vector<10x256xf32>
    %133 = arith.cmpf oeq, %127, %132 : vector<10x256xf32>
    %c10_i32 = arith.constant 10 : i32
    %134 = vector.broadcast %c10_i32 : i32 to vector<10x256xi32>
    %135 = arith.select %133, %128, %134 : vector<10x256xi1>, vector<10x256xi32>
    %cst_61 = arith.constant dense<2147483647> : vector<256xi32>
    %136 = vector.multi_reduction <minsi>, %135, %cst_61 [0] : vector<10x256xi32> to vector<256xi32>
    %137 = vector.shape_cast %136 : vector<256xi32> to vector<1x256xi32>
    %138 = vector.broadcast %137 : vector<1x256xi32> to vector<10x256xi32>
    %139 = arith.cmpi eq, %128, %138 : vector<10x256xi32>
    %140 = arith.extui %139 : vector<10x256xi1> to vector<10x256xi32>
    %141 = arith.sitofp %140 : vector<10x256xi32> to vector<10x256xf32>
    %142 = arith.mulf %141, %118 : vector<10x256xf32>
    %cst_62 = arith.constant dense<0.000000e+00> : vector<256xf32>
    %143 = vector.multi_reduction <add>, %142, %cst_62 [0] : vector<10x256xf32> to vector<256xf32>
    %144 = vector.shape_cast %143 : vector<256xf32> to vector<1x256xf32>
    %145 = arith.addf %16, %144 : vector<1x256xf32>
    %146 = vector.broadcast %8 : f32 to vector<1x256xf32>
    %147 = arith.addf %145, %146 : vector<1x256xf32>
    %148 = arith.negf %147 : vector<1x256xf32>
    %149 = math.exp %148 : vector<1x256xf32>
    %cst_63 = arith.constant 1.000000e+00 : f32
    %150 = vector.broadcast %cst_63 : f32 to vector<1x256xf32>
    %151 = arith.addf %150, %149 : vector<1x256xf32>
    %152 = arith.divf %150, %151 : vector<1x256xf32>
    %153 = vector.broadcast %152 : vector<1x256xf32> to vector<10x256xf32>
    %154 = arith.mulf %141, %153 : vector<10x256xf32>
    %155 = arith.addf %129, %154 : vector<10x256xf32>
    %cst_64 = arith.constant 0xFF800000 : f32
    %156 = vector.broadcast %cst_64 : f32 to vector<10x256xf32>
    %157 = arith.select %139, %156, %127 : vector<10x256xi1>, vector<10x256xf32>
    %cst_65 = arith.constant dense<0xFF800000> : vector<256xf32>
    %158 = vector.multi_reduction <maximumf>, %157, %cst_65 [0] : vector<10x256xf32> to vector<256xf32>
    %159 = vector.shape_cast %158 : vector<256xf32> to vector<1x256xf32>
    %160 = vector.broadcast %159 : vector<1x256xf32> to vector<10x256xf32>
    %161 = arith.cmpf oeq, %157, %160 : vector<10x256xf32>
    %c10_i32_66 = arith.constant 10 : i32
    %162 = vector.broadcast %c10_i32_66 : i32 to vector<10x256xi32>
    %163 = arith.select %161, %128, %162 : vector<10x256xi1>, vector<10x256xi32>
    %cst_67 = arith.constant dense<2147483647> : vector<256xi32>
    %164 = vector.multi_reduction <minsi>, %163, %cst_67 [0] : vector<10x256xi32> to vector<256xi32>
    %165 = vector.shape_cast %164 : vector<256xi32> to vector<1x256xi32>
    %166 = vector.broadcast %165 : vector<1x256xi32> to vector<10x256xi32>
    %167 = arith.cmpi eq, %128, %166 : vector<10x256xi32>
    %168 = arith.extui %167 : vector<10x256xi1> to vector<10x256xi32>
    %169 = arith.sitofp %168 : vector<10x256xi32> to vector<10x256xf32>
    %170 = arith.mulf %169, %118 : vector<10x256xf32>
    %cst_68 = arith.constant dense<0.000000e+00> : vector<256xf32>
    %171 = vector.multi_reduction <add>, %170, %cst_68 [0] : vector<10x256xf32> to vector<256xf32>
    %172 = vector.shape_cast %171 : vector<256xf32> to vector<1x256xf32>
    %173 = arith.addf %16, %172 : vector<1x256xf32>
    %174 = vector.broadcast %8 : f32 to vector<1x256xf32>
    %175 = arith.addf %173, %174 : vector<1x256xf32>
    %176 = arith.negf %175 : vector<1x256xf32>
    %177 = math.exp %176 : vector<1x256xf32>
    %cst_69 = arith.constant 1.000000e+00 : f32
    %178 = vector.broadcast %cst_69 : f32 to vector<1x256xf32>
    %179 = arith.addf %178, %177 : vector<1x256xf32>
    %180 = arith.divf %178, %179 : vector<1x256xf32>
    %181 = vector.broadcast %180 : vector<1x256xf32> to vector<10x256xf32>
    %182 = arith.mulf %169, %181 : vector<10x256xf32>
    %183 = arith.addf %155, %182 : vector<10x256xf32>
    %cst_70 = arith.constant 0xFF800000 : f32
    %184 = vector.broadcast %cst_70 : f32 to vector<10x256xf32>
    %185 = arith.select %167, %184, %157 : vector<10x256xi1>, vector<10x256xf32>
    %cst_71 = arith.constant dense<0xFF800000> : vector<256xf32>
    %186 = vector.multi_reduction <maximumf>, %185, %cst_71 [0] : vector<10x256xf32> to vector<256xf32>
    %187 = vector.shape_cast %186 : vector<256xf32> to vector<1x256xf32>
    %188 = vector.broadcast %187 : vector<1x256xf32> to vector<10x256xf32>
    %189 = arith.cmpf oeq, %185, %188 : vector<10x256xf32>
    %c10_i32_72 = arith.constant 10 : i32
    %190 = vector.broadcast %c10_i32_72 : i32 to vector<10x256xi32>
    %191 = arith.select %189, %128, %190 : vector<10x256xi1>, vector<10x256xi32>
    %cst_73 = arith.constant dense<2147483647> : vector<256xi32>
    %192 = vector.multi_reduction <minsi>, %191, %cst_73 [0] : vector<10x256xi32> to vector<256xi32>
    %193 = vector.shape_cast %192 : vector<256xi32> to vector<1x256xi32>
    %194 = vector.broadcast %193 : vector<1x256xi32> to vector<10x256xi32>
    %195 = arith.cmpi eq, %128, %194 : vector<10x256xi32>
    %196 = arith.extui %195 : vector<10x256xi1> to vector<10x256xi32>
    %197 = arith.sitofp %196 : vector<10x256xi32> to vector<10x256xf32>
    %198 = arith.mulf %197, %118 : vector<10x256xf32>
    %cst_74 = arith.constant dense<0.000000e+00> : vector<256xf32>
    %199 = vector.multi_reduction <add>, %198, %cst_74 [0] : vector<10x256xf32> to vector<256xf32>
    %200 = vector.shape_cast %199 : vector<256xf32> to vector<1x256xf32>
    %201 = arith.addf %16, %200 : vector<1x256xf32>
    %202 = vector.broadcast %8 : f32 to vector<1x256xf32>
    %203 = arith.addf %201, %202 : vector<1x256xf32>
    %204 = arith.negf %203 : vector<1x256xf32>
    %205 = math.exp %204 : vector<1x256xf32>
    %cst_75 = arith.constant 1.000000e+00 : f32
    %206 = vector.broadcast %cst_75 : f32 to vector<1x256xf32>
    %207 = arith.addf %206, %205 : vector<1x256xf32>
    %208 = arith.divf %206, %207 : vector<1x256xf32>
    %209 = vector.broadcast %208 : vector<1x256xf32> to vector<10x256xf32>
    %210 = arith.mulf %197, %209 : vector<10x256xf32>
    %211 = arith.addf %183, %210 : vector<10x256xf32>
    %cst_76 = arith.constant 0xFF800000 : f32
    %212 = vector.broadcast %cst_76 : f32 to vector<10x256xf32>
    %213 = arith.select %195, %212, %185 : vector<10x256xi1>, vector<10x256xf32>
    %cst_77 = arith.constant dense<0xFF800000> : vector<256xf32>
    %214 = vector.multi_reduction <maximumf>, %213, %cst_77 [0] : vector<10x256xf32> to vector<256xf32>
    %215 = vector.shape_cast %214 : vector<256xf32> to vector<1x256xf32>
    %216 = vector.broadcast %215 : vector<1x256xf32> to vector<10x256xf32>
    %217 = arith.cmpf oeq, %213, %216 : vector<10x256xf32>
    %c10_i32_78 = arith.constant 10 : i32
    %218 = vector.broadcast %c10_i32_78 : i32 to vector<10x256xi32>
    %219 = arith.select %217, %128, %218 : vector<10x256xi1>, vector<10x256xi32>
    %cst_79 = arith.constant dense<2147483647> : vector<256xi32>
    %220 = vector.multi_reduction <minsi>, %219, %cst_79 [0] : vector<10x256xi32> to vector<256xi32>
    %221 = vector.shape_cast %220 : vector<256xi32> to vector<1x256xi32>
    %222 = vector.broadcast %221 : vector<1x256xi32> to vector<10x256xi32>
    %223 = arith.cmpi eq, %128, %222 : vector<10x256xi32>
    %224 = arith.extui %223 : vector<10x256xi1> to vector<10x256xi32>
    %225 = arith.sitofp %224 : vector<10x256xi32> to vector<10x256xf32>
    %226 = arith.mulf %225, %118 : vector<10x256xf32>
    %cst_80 = arith.constant dense<0.000000e+00> : vector<256xf32>
    %227 = vector.multi_reduction <add>, %226, %cst_80 [0] : vector<10x256xf32> to vector<256xf32>
    %228 = vector.shape_cast %227 : vector<256xf32> to vector<1x256xf32>
    %229 = arith.addf %16, %228 : vector<1x256xf32>
    %230 = vector.broadcast %8 : f32 to vector<1x256xf32>
    %231 = arith.addf %229, %230 : vector<1x256xf32>
    %232 = arith.negf %231 : vector<1x256xf32>
    %233 = math.exp %232 : vector<1x256xf32>
    %cst_81 = arith.constant 1.000000e+00 : f32
    %234 = vector.broadcast %cst_81 : f32 to vector<1x256xf32>
    %235 = arith.addf %234, %233 : vector<1x256xf32>
    %236 = arith.divf %234, %235 : vector<1x256xf32>
    %237 = vector.broadcast %236 : vector<1x256xf32> to vector<10x256xf32>
    %238 = arith.mulf %225, %237 : vector<10x256xf32>
    %239 = arith.addf %211, %238 : vector<10x256xf32>
    %c0_82 = arith.constant 0 : index
    %c0_83 = arith.constant 0 : index
    %c0_84 = arith.constant 0 : index
    %c0_85 = arith.constant 0 : index
    %240 = vector.load %arg3[%c0_82, %c0_83, %c0_84, %c0_85] : memref<1x10x16x256xf32, #tpu.memory_space<vmem>>, vector<1x1x16x256xf32>
    %241 = vector.shape_cast %240 : vector<1x1x16x256xf32> to vector<16x256xf32>
    %242 = vector.extract_strided_slice %239 {offsets = [0, 0], sizes = [1, 256], strides = [1, 1]} : vector<10x256xf32> to vector<1x256xf32>
    %243 = vector.broadcast %242 : vector<1x256xf32> to vector<16x256xf32>
    %244 = arith.mulf %241, %243 : vector<16x256xf32>
    %245 = arith.addf %1, %244 : vector<16x256xf32>
    %c0_86 = arith.constant 0 : index
    %c1_87 = arith.constant 1 : index
    %c0_88 = arith.constant 0 : index
    %c0_89 = arith.constant 0 : index
    %246 = vector.load %arg3[%c0_86, %c1_87, %c0_88, %c0_89] : memref<1x10x16x256xf32, #tpu.memory_space<vmem>>, vector<1x1x16x256xf32>
    %247 = vector.shape_cast %246 : vector<1x1x16x256xf32> to vector<16x256xf32>
    %248 = vector.extract_strided_slice %239 {offsets = [1, 0], sizes = [1, 256], strides = [1, 1]} : vector<10x256xf32> to vector<1x256xf32>
    %249 = vector.broadcast %248 : vector<1x256xf32> to vector<16x256xf32>
    %250 = arith.mulf %247, %249 : vector<16x256xf32>
    %251 = arith.addf %245, %250 : vector<16x256xf32>
    %c0_90 = arith.constant 0 : index
    %c2_91 = arith.constant 2 : index
    %c0_92 = arith.constant 0 : index
    %c0_93 = arith.constant 0 : index
    %252 = vector.load %arg3[%c0_90, %c2_91, %c0_92, %c0_93] : memref<1x10x16x256xf32, #tpu.memory_space<vmem>>, vector<1x1x16x256xf32>
    %253 = vector.shape_cast %252 : vector<1x1x16x256xf32> to vector<16x256xf32>
    %254 = vector.extract_strided_slice %239 {offsets = [2, 0], sizes = [1, 256], strides = [1, 1]} : vector<10x256xf32> to vector<1x256xf32>
    %255 = vector.broadcast %254 : vector<1x256xf32> to vector<16x256xf32>
    %256 = arith.mulf %253, %255 : vector<16x256xf32>
    %257 = arith.addf %251, %256 : vector<16x256xf32>
    %c0_94 = arith.constant 0 : index
    %c3_95 = arith.constant 3 : index
    %c0_96 = arith.constant 0 : index
    %c0_97 = arith.constant 0 : index
    %258 = vector.load %arg3[%c0_94, %c3_95, %c0_96, %c0_97] : memref<1x10x16x256xf32, #tpu.memory_space<vmem>>, vector<1x1x16x256xf32>
    %259 = vector.shape_cast %258 : vector<1x1x16x256xf32> to vector<16x256xf32>
    %260 = vector.extract_strided_slice %239 {offsets = [3, 0], sizes = [1, 256], strides = [1, 1]} : vector<10x256xf32> to vector<1x256xf32>
    %261 = vector.broadcast %260 : vector<1x256xf32> to vector<16x256xf32>
    %262 = arith.mulf %259, %261 : vector<16x256xf32>
    %263 = arith.addf %257, %262 : vector<16x256xf32>
    %c0_98 = arith.constant 0 : index
    %c4_99 = arith.constant 4 : index
    %c0_100 = arith.constant 0 : index
    %c0_101 = arith.constant 0 : index
    %264 = vector.load %arg3[%c0_98, %c4_99, %c0_100, %c0_101] : memref<1x10x16x256xf32, #tpu.memory_space<vmem>>, vector<1x1x16x256xf32>
    %265 = vector.shape_cast %264 : vector<1x1x16x256xf32> to vector<16x256xf32>
    %266 = vector.extract_strided_slice %239 {offsets = [4, 0], sizes = [1, 256], strides = [1, 1]} : vector<10x256xf32> to vector<1x256xf32>
    %267 = vector.broadcast %266 : vector<1x256xf32> to vector<16x256xf32>
    %268 = arith.mulf %265, %267 : vector<16x256xf32>
    %269 = arith.addf %263, %268 : vector<16x256xf32>
    %c0_102 = arith.constant 0 : index
    %c5_103 = arith.constant 5 : index
    %c0_104 = arith.constant 0 : index
    %c0_105 = arith.constant 0 : index
    %270 = vector.load %arg3[%c0_102, %c5_103, %c0_104, %c0_105] : memref<1x10x16x256xf32, #tpu.memory_space<vmem>>, vector<1x1x16x256xf32>
    %271 = vector.shape_cast %270 : vector<1x1x16x256xf32> to vector<16x256xf32>
    %272 = vector.extract_strided_slice %239 {offsets = [5, 0], sizes = [1, 256], strides = [1, 1]} : vector<10x256xf32> to vector<1x256xf32>
    %273 = vector.broadcast %272 : vector<1x256xf32> to vector<16x256xf32>
    %274 = arith.mulf %271, %273 : vector<16x256xf32>
    %275 = arith.addf %269, %274 : vector<16x256xf32>
    %c0_106 = arith.constant 0 : index
    %c6_107 = arith.constant 6 : index
    %c0_108 = arith.constant 0 : index
    %c0_109 = arith.constant 0 : index
    %276 = vector.load %arg3[%c0_106, %c6_107, %c0_108, %c0_109] : memref<1x10x16x256xf32, #tpu.memory_space<vmem>>, vector<1x1x16x256xf32>
    %277 = vector.shape_cast %276 : vector<1x1x16x256xf32> to vector<16x256xf32>
    %278 = vector.extract_strided_slice %239 {offsets = [6, 0], sizes = [1, 256], strides = [1, 1]} : vector<10x256xf32> to vector<1x256xf32>
    %279 = vector.broadcast %278 : vector<1x256xf32> to vector<16x256xf32>
    %280 = arith.mulf %277, %279 : vector<16x256xf32>
    %281 = arith.addf %275, %280 : vector<16x256xf32>
    %c0_110 = arith.constant 0 : index
    %c7_111 = arith.constant 7 : index
    %c0_112 = arith.constant 0 : index
    %c0_113 = arith.constant 0 : index
    %282 = vector.load %arg3[%c0_110, %c7_111, %c0_112, %c0_113] : memref<1x10x16x256xf32, #tpu.memory_space<vmem>>, vector<1x1x16x256xf32>
    %283 = vector.shape_cast %282 : vector<1x1x16x256xf32> to vector<16x256xf32>
    %284 = vector.extract_strided_slice %239 {offsets = [7, 0], sizes = [1, 256], strides = [1, 1]} : vector<10x256xf32> to vector<1x256xf32>
    %285 = vector.broadcast %284 : vector<1x256xf32> to vector<16x256xf32>
    %286 = arith.mulf %283, %285 : vector<16x256xf32>
    %287 = arith.addf %281, %286 : vector<16x256xf32>
    %c0_114 = arith.constant 0 : index
    %c8_115 = arith.constant 8 : index
    %c0_116 = arith.constant 0 : index
    %c0_117 = arith.constant 0 : index
    %288 = vector.load %arg3[%c0_114, %c8_115, %c0_116, %c0_117] : memref<1x10x16x256xf32, #tpu.memory_space<vmem>>, vector<1x1x16x256xf32>
    %289 = vector.shape_cast %288 : vector<1x1x16x256xf32> to vector<16x256xf32>
    %290 = vector.extract_strided_slice %239 {offsets = [8, 0], sizes = [1, 256], strides = [1, 1]} : vector<10x256xf32> to vector<1x256xf32>
    %291 = vector.broadcast %290 : vector<1x256xf32> to vector<16x256xf32>
    %292 = arith.mulf %289, %291 : vector<16x256xf32>
    %293 = arith.addf %287, %292 : vector<16x256xf32>
    %c0_118 = arith.constant 0 : index
    %c9_119 = arith.constant 9 : index
    %c0_120 = arith.constant 0 : index
    %c0_121 = arith.constant 0 : index
    %294 = vector.load %arg3[%c0_118, %c9_119, %c0_120, %c0_121] : memref<1x10x16x256xf32, #tpu.memory_space<vmem>>, vector<1x1x16x256xf32>
    %295 = vector.shape_cast %294 : vector<1x1x16x256xf32> to vector<16x256xf32>
    %296 = vector.extract_strided_slice %239 {offsets = [9, 0], sizes = [1, 256], strides = [1, 1]} : vector<10x256xf32> to vector<1x256xf32>
    %297 = vector.broadcast %296 : vector<1x256xf32> to vector<16x256xf32>
    %298 = arith.mulf %295, %297 : vector<16x256xf32>
    %299 = arith.addf %293, %298 : vector<16x256xf32>
    %c0_122 = arith.constant 0 : index
    %c0_123 = arith.constant 0 : index
    %c0_124 = arith.constant 0 : index
    %300 = vector.load %arg6[%c0_122, %c0_123, %c0_124] : memref<1x16x256xf32, #tpu.memory_space<vmem>>, vector<1x16x256xf32>
    %301 = vector.shape_cast %300 : vector<1x16x256xf32> to vector<16x256xf32>
    %302 = vector.shape_cast %299 : vector<16x256xf32> to vector<1x16x256xf32>
    tpu.vector_store %arg6[%c0_122, %c0_123, %c0_124], %302 {strides = array<i32>} : memref<1x16x256xf32, #tpu.memory_space<vmem>>, vector<1x16x256xf32>,
    return
  }
  func.func @transform_0(%arg0: i32, %arg1: i32) -> (i32, i32, i32) {
    %c0_i32 = arith.constant 0 : i32
    %c0_i32_0 = arith.constant 0 : i32
    return %arg0, %c0_i32, %arg1 : i32, i32, i32
  }
  func.func @transform_1(%arg0: i32, %arg1: i32) -> (i32, i32, i32, i32) {
    %c0_i32 = arith.constant 0 : i32
    %c0_i32_0 = arith.constant 0 : i32
    %c0_i32_1 = arith.constant 0 : i32
    return %arg0, %c0_i32, %c0_i32_0, %arg1 : i32, i32, i32, i32
  }
  func.func @transform_2(%arg0: i32, %arg1: i32) -> (i32, i32) {
    %c0_i32 = arith.constant 0 : i32
    %c0_i32_0 = arith.constant 0 : i32
    %c0_i32_1 = arith.constant 0 : i32
    return %c0_i32, %c0_i32_0 : i32, i32
  }
  func.func @transform_3(%arg0: i32, %arg1: i32) -> i32 {
    %c0_i32 = arith.constant 0 : i32
    %c0_i32_0 = arith.constant 0 : i32
    return %c0_i32 : i32
  }
  func.func @transform_4(%arg0: i32, %arg1: i32) -> (i32, i32, i32) {
    %c0_i32 = arith.constant 0 : i32
    %c0_i32_0 = arith.constant 0 : i32
    return %arg0, %c0_i32, %arg1 : i32, i32, i32
  }
}

</mosaic_0001>

<bundles_post_ra>
// kernel: tpu_custom_call.1
= control target key start
LH: loop header
LB: loop body
LE: loop exit
PB: predicated region body
PF: predicated region fallthrough
CT: control target
= control target key end

     0   :  { %s3138_s0 = inlined_call_operand.hbm [shape: f32[2,16,512], index: 0, kind: input, shape index: {}]   ;;  %s3139_s1 = inlined_call_operand.hbm [shape: f32[2,10,16,512], index: 1, kind: input, shape index: {}]   ;;  %s3140_s2 = inlined_call_operand.vmem [shape: f32[16,4], index: 2, kind: input, shape index: {}]   ;;  %s3141_s3 = inlined_call_operand.vmem [shape: f32[2], index: 3, kind: input, shape index: {}]   ;;  %s3142_s4 = inlined_call_operand.hbm [shape: f32[2,16,512], index: 4, kind: output, shape index: {}]  }
   0x1   :  { %3166 = sst [smem:[#allocation33_spill]] %s3138_s0 }
   0x2   :  { %3167 = sst [smem:[#allocation34_spill]] %s3141_s3 }
   0x3   :  { %3168 = sst [smem:[#allocation35_spill]] %s3142_s4 }
   0x4   :  { %9 = vsyncpa [#allocation3], 0 }
   0x5   :  { %11 = vsyncpa [#allocation3 + $0x1], 0 }
   0x6   :  { %12 = vsyncpa [#allocation7], 0 }
   0x7   :  { %14 = vsyncpa [#allocation7 + $0x1], 0 }
   0x8   :  { %15 = vsyncpa [#allocation5], 0 }
   0x9   :  { %16 = vsyncpa [#allocation4], 0 }
   0xa   :  { %18 = vsyncpa [#allocation4 + $0x1], 0  ;;  %s2110_s15 = smov 0   ;;  %s2112_s16 = smov 0  }
   0xb   :  { %s2114_s17 = smov 0   ;;  %s2116_s18 = smov 0  }
   0xc   :  { %s2118_s19 = smov 0   ;;  %s2120_s20 = smov 0  }
   0xd   :  { %s2122_s21 = smov 0   ;;  %s2124_s22 = smov 0  }
   0xe LB: > { %3169 = sst [smem:[#allocation14_spill]] %s2040_s15  ;;  %s1594_s23 = sadd.s32 4294967295, %s2068_s22   ;;  %s2068_s22 = sphi %s2124_s22, %s24_s22   ;;  %s2064_s21 = sphi %s2122_s21, %s3229_s21   ;;  %s2060_s20 = sphi %s2120_s20, %s3228_s20   ;;  %s2056_s19 = sphi %s2118_s19, %s3227_s19   ;;  %s2052_s18 = sphi %s2116_s18, %s3226_s18   ;;  %s2048_s17 = sphi %s2114_s17, %s3225_s17   ;;  %s2044_s16 = sphi %s2112_s16, %s3224_s16   ;;  %s2040_s15 = sphi %s2110_s15, %s3223_s15  }
   0xf   : > { %3170 = sst [smem:[#allocation15_spill]] %s2068_s22  ;;  %s1595_s24 = sadd.s32 4294967294, %s2068_s22  }
  0x10   : > { %p52_p0 = scmp.ne.s32.totalorder %s2048_s17, %s2044_s16  ;;  %p53_p1 = scmp.eq.s32.totalorder %s2068_s22, 0 }
  0x11   : > { %p58_p2 = scmp.ne.s32.totalorder %s2044_s16, %s2040_s15  ;;  %p2158_p3 = scmp.eq.s32.totalorder %s1594_s23, 0 }
  0x12   : > { %p154_p4 = scmp.eq.s32.totalorder %s1594_s23, 3  ;;  %p54_p5 = por %p53_p1, %p52_p0 }
  0x13   : > { %p160_p6 = scmp.eq.s32.totalorder %s1595_s24, 3  ;;  %p2164_p7 = por %p2158_p3, %p58_p2 }
  0x14   : > { %p2168_p8 = por %p154_p4, %p52_p0  ;;  %p1596_p10 = scmp.ge.s32.totalorder %s2068_s22, 1 }
  0x15   : > { %s3172_s27 = scalar_select %p2164_p7, 1, 0 }
  0x16   : > { %s3173_s28 = scalar_select %p2168_p8, 1, 0 }
  0x17   : > { %p2172_p9 = por %p160_p6, %p58_p2  ;;  %p167_p11 = scmp.lt.s32.totalorder %s2068_s22, 5 }
  0x18   : > { %s3176_s3 = sld [smem:[#allocation34_spill]]  ;;  %p1709_p13 = scmp.lt.s32.totalorder %s2068_s22, 4 }
  0x19   : > { %s3174_s29 = scalar_select %p2172_p9, 1, 0 }
  0x1a   : > { %p2181_p12 = pnand %p1596_p10, %p167_p11  ;;  %p2188_p1 = pnand %p1709_p13, %p54_p5 }
  0x1b   : > { %3175 = sst [smem:[#allocation16_spill]] %s3174_s29  ;;  %s33_s9 = sadd.s32 1, %s2060_s20 }
  0x1c   : > { %s3177_s7 = scalar_select %p2181_p12, 1, 0 }
  0x1d   : > { %p1693_p0 = pneg %p2181_p12 }
  0x1e   : > { %s183_s6 = sshll.u32 %s3176_s3, 4  ;;  %s184_s6 = int_to_ptr.vmem [resolvable:$true] %s183_s6 }
  0x1f   : > { %p1694_p2 = pnand %p1693_p0, %p2158_p3  ;;  %s1887_s10 = scalar_lea.vmem %s184_s6, 16 }
  0x20   : > { %p1888_p4 = scmp.ne.s32.totalorder %s184_s6, %s1887_s10  ;;  %p1895_p11 = scmp.lt.s32.totalorder %s184_s6, %s184_s6 }
  0x21   : > { %p1889_p6 = pneg %p1694_p2  ;;  %p1896_p8 = scmp.lt.s32.totalorder %s1887_s10, %s1887_s10 }
  0x23   : > { %p1890_p9 = pnand %p1889_p6, %p1888_p4  ;;  %p1897_p7 = por %p1896_p8, %p1895_p11 }
  0x25   : > { %p1891_p10 = pneg %p1890_p9 }
  0x27   : > { %p1898_p12 = pnand %p1897_p7, %p1891_p10 }
  0x29   : > { %1901 = shalt.err (!%p1898_p12)
}
  0x2a   : > { %s2070_s11 = smov [#allocation8]   ;;  %p34_p5 = scmp.ge.s32.totalorder %s33_s9, 2 }
  0x2b   : > { %1696 = dma.vmem_to_smem (!%p1694_p2), %s184_s6, 16, %s2070_s11, [#allocation5]  }
  0x2c   : > { %s36_s12 = sadd.s32 1, %s2064_s21  ;;  %s2197_s13 = sand.u32 1, %s2048_s17  }
  0x2d   : > { %s1600_s14 = sshll.u32 %s2060_s20, 1  ;;  %s3231_s9 = smov (%p34_p5, %s33_s9), 0 }
  0x2e   : > { %3179 = sst [smem:[#allocation17_spill]] %s3231_s9  ;;  %s3233_s12 = smov (!%p34_p5, %s36_s12), %s2064_s21 }
  0x2f   : > { %s41_s23 = ssub.s32 %s2060_s20, %s3231_s9  ;;  %p38_p7 = scmp.ge.s32.totalorder %s3233_s12, 2 }
  0x30   : > { %s1599_s24 = sshll.u32 %s2197_s13, 5  ;;  %s1601_s30 = sshll.u32 %s2064_s21, 3 }
  0x31   : > { %s3235_s12 = smov (%p38_p7, %s3233_s12), 0  ;;  %s204_s5 = sadd.s32 %s1601_s30, %s1600_s14 }
  0x32   : > { %3180 = sst [smem:[#allocation18_spill]] %s3235_s12  ;;  %s198_s6 = scalar_lea.vmem [#allocation2], %s1599_s24 }
  0x33   : > { %s207_s10 = sshll.u32 %s198_s6, 4  ;;  %s40_s11 = ssub.s32 %s2064_s21, %s3235_s12  ;;  %s2218_s10 = int_to_ptr.vmem [resolvable:$true] %s207_s10 }
  0x34   : > { %s1602_s25 = sshll.u32 %s204_s5, 7  ;;  %s42_s3 = sor.u32 %s41_s23, %s40_s11 }
  0x35   : > { %s3181_s0 = sld [smem:[#allocation33_spill]]  ;;  %p43_p8 = scmp.eq.s32.totalorder %s42_s3, 0 }
  0x36   : > { %s3182_s9 = sadd.s32 1, %s2048_s17  ;;  %s195_s24 = scalar_lea.sflag [#allocation3], %s2197_s13 }
  0x37   : > { %s2223_s4 = scalar_select %p43_p8, %s2048_s17, %s3182_s9  }
  0x38   : > { %p1904_p12 = pneg %p2188_p1 }
  0x39   : > { %3183 = sst [smem:[#allocation19_spill]] %s2223_s4 }
  0x3b   : > { %s2216_s22 = scalar_lea.hbm %s3181_s0, %s1602_s25  ;;  %s1907_s29 = scalar_lea.hbm %s3181_s0, 2048 }
  0x3c   : > { %s1902_s30 = scalar_lea.hbm %s2216_s22, 512  ;;  %p1908_p2 = scmp.lt.u32.totalorder %s2216_s22, %s3181_s0 }
  0x3d   : > { %p1903_p9 = scmp.ne.s32.totalorder %s2216_s22, %s1902_s30  ;;  %p1909_p4 = scmp.lt.u32.totalorder %s1907_s29, %s1902_s30 }
  0x3e   : > { %p1911_p10 = scmp.lt.u32.totalorder %s1902_s30, %s2216_s22 }
  0x3f   : > { %p1905_p13 = pnand %p1904_p12, %p1903_p9  ;;  %p1910_p6 = por %p1909_p4, %p1908_p2 }
  0x41   : > { %p1906_p0 = pneg %p1905_p13  ;;  %p1912_p11 = por %p1911_p10, %p1910_p6 }
  0x43   : > { %p1913_p5 = pnand %p1912_p11, %p1906_p0 }
  0x45   : > { %1916 = shalt.err (!%p1913_p5)
}
  0x46   : > { %s1917_s9 = scalar_lea.vmem %s2218_s10, 512  ;;  %s2071_s5 = smov [#allocation2]  }
  0x47   : > { %p1918_p7 = scmp.ne.s32.totalorder %s2218_s10, %s1917_s9  ;;  %s1922_s6 = sshll.u32 %s2071_s5, 4  ;;  %s1923_s6 = int_to_ptr.vmem [resolvable:$false] %s1922_s6 }
  0x48   : > { %s1924_s11 = scalar_lea.vmem %s1923_s6, 1024  ;;  %p1925_p13 = scmp.lt.s32.totalorder %s2218_s10, %s1923_s6 }
  0x49   : > { %p1920_p8 = pnand %p1918_p7, %p1904_p12  ;;  %p1926_p2 = scmp.lt.s32.totalorder %s1924_s11, %s1917_s9 }
  0x4b   : > { %p1921_p9 = pneg %p1920_p8  ;;  %p1927_p4 = por %p1926_p2, %p1925_p13 }
  0x4d   : > { %p1928_p6 = pnand %p1927_p4, %p1921_p9 }
  0x4f   : > { %1931 = shalt.err (!%p1928_p6)
}
  0x50   : > { %s2072_s30 = smov 512   ;;  %s2073_s15 = smov 256  }
  0x51   : > { %s2074_s25 = smov 16   ;;  %s1680_s29 = smul.u32 320, %s2197_s13 }
  0x52   : > { %1700 = dma.hbm_to_vmem [thread:$0]  (!%p2188_p1), %s2216_s22, 512, %s2218_s10, %s195_s24, %s2072_s30, %s2073_s15, %s2074_s25  }
  0x53   : > { %s1681_s23 = smul.u32 80, %s2064_s21  ;;  %s221_s9 = scalar_lea.vmem [#allocation6], %s1680_s29 }
  0x54   : > { %s230_s5 = sshll.u32 %s221_s9, 4  ;;  %s218_s4 = scalar_lea.sflag [#allocation7], %s2197_s13  ;;  %s2260_s5 = int_to_ptr.vmem [resolvable:$true] %s230_s5 }
  0x55   : > { %s227_s3 = sadd.s32 %s1681_s23, %s1600_s14  ;;  %s1937_s24 = scalar_lea.hbm %s3139_s1, 20480 }
  0x56   : > { %s1604_s6 = sshll.u32 %s227_s3, 7 }
  0x57   : > { %s2265_s12 = scalar_lea.hbm %s3139_s1, %s1604_s6 }
  0x58   : > { %s1932_s22 = scalar_lea.hbm %s2265_s12, 5120  ;;  %p1938_p5 = scmp.lt.u32.totalorder %s2265_s12, %s3139_s1 }
  0x59   : > { %p1933_p0 = scmp.ne.s32.totalorder %s2265_s12, %s1932_s22  ;;  %p1939_p7 = scmp.lt.u32.totalorder %s1937_s24, %s1932_s22 }
  0x5a   : > { %p1941_p9 = scmp.lt.u32.totalorder %s1932_s22, %s2265_s12 }
  0x5b   : > { %p1935_p10 = pnand %p1933_p0, %p1904_p12  ;;  %p1940_p8 = por %p1939_p7, %p1938_p5 }
  0x5d   : > { %p1936_p11 = pneg %p1935_p10  ;;  %p1942_p13 = por %p1941_p9, %p1940_p8 }
  0x5f   : > { %p1943_p2 = pnand %p1942_p13, %p1936_p11 }
  0x61   : > { %1946 = shalt.err (!%p1943_p2)
}
  0x62   : > { %s1947_s0 = scalar_lea.vmem %s2260_s5, 5120  ;;  %s2075_s3 = smov [#allocation6]  }
  0x63   : > { %p1948_p4 = scmp.ne.s32.totalorder %s2260_s5, %s1947_s0  ;;  %s1952_s9 = sshll.u32 %s2075_s3, 4  ;;  %s1953_s9 = int_to_ptr.vmem [resolvable:$false] %s1952_s9 }
  0x64   : > { %s1954_s6 = scalar_lea.vmem %s1953_s9, 10240  ;;  %p1955_p10 = scmp.lt.s32.totalorder %s2260_s5, %s1953_s9 }
  0x65   : > { %p1950_p6 = pnand %p1948_p4, %p1904_p12  ;;  %p1956_p5 = scmp.lt.s32.totalorder %s1954_s6, %s1947_s0 }
  0x67   : > { %p1951_p0 = pneg %p1950_p6  ;;  %p1957_p7 = por %p1956_p5, %p1955_p10 }
  0x69   : > { %p1958_p8 = pnand %p1957_p7, %p1951_p0 }
  0x6b   : > { %1961 = shalt.err (!%p1958_p8)
}
  0x6c   : > { %1703 = dma.hbm_to_vmem [thread:$0]  (!%p2188_p1), %s2265_s12, 5120, %s2260_s5, %s218_s4, %s2072_s30, %s2073_s15, %s2074_s25  }
  0x6d   : > { %p3184_p12 = scmp.ne.s32.totalorder %s3177_s7, 0 }
  0x6f   : > { %242 = sbr.rel (%p3184_p12) target bundleno = 633 (0x279), region = 36 }
  0x76   : > { %s2299_s11 = sand.u32 1, %s2044_s16   ;;  %p3185_p11 = scmp.ne.s32.totalorder %s3172_s27, 0 }
  0x77   : > { %s1606_s22 = sshll.u32 %s2299_s11, 5  ;;  %s245_s8 = scalar_lea.sflag [#allocation3], %s2299_s11 }
  0x78   : > { %s2305_s14 = scalar_lea.vmem [#allocation2], %s1606_s22 }
  0x79   : > { %2023 = dma.done.wait (%p3185_p11), %s245_s8, 512  }
  0x7a   : > { %2025 = vsyncadd (%p3185_p11), %s245_s8, 4294966784  ;;  %s1682_s4 = smul.u32 320, %s2299_s11  ;;  %s254_s7 = scalar_lea.sflag [#allocation7], %s2299_s11 }
  0x7c   : > { %s2313_s12 = scalar_lea.vmem [#allocation6], %s1682_s4 }
  0x7d   : > { %2027 = dma.done.wait (%p3185_p11), %s254_s7, 5120  }
  0x7e   : > { %2029 = vsyncadd (%p3185_p11), %s254_s7, 4294962176 }
  0x7f   : > { %2031 = dma.done.wait (%p2158_p3), [#allocation5], 16  }
  0x80   : > { %2033 = vsyncadd (%p2158_p3), [#allocation5], 4294967280 }
  0x81   : > { %266 = sfence }
  0x82   : > { %v299_v0 = vld [vmem:[%s3140_s2] sm:$0xff]  ;;  %v2076_v1 = vmov 1   ;;  %v2077_v2 = vmov 0   ;;  %v300_v3 = vld [vmem:[%s3140_s2 + $0x8] sm:$0xff]  ;;  %v2078_v4 = vmov 3   ;;  %v2079_v5 = vmov 2  }
  0x83   : > { %1788 = vset.pattern.permute.xlu0 %v2076_v1  ;;  %1789 = vset.pattern.permute.xlu1 %v2077_v2  ;;  %v2332_v8 = vld [vmem:[%s2305_s14] sm:$0xff]  ;;  %v358_v10 = vld [vmem:[%s2313_s12 + $0x8] sm:$0xff]  ;;  %v359_v11 = vld [vmem:[%s2313_s12 + $0x10] sm:$0xff]  ;;  %vm782_vm0 = vcmask 1040384   ;;  %vm785_vm1 = vcmask 1041408   ;;  %vm788_vm2 = vcmask 1042432  }
  0x84   : > { %305 = vperm.xlu1 %1789, %v299_v0   ;;  %362 = vperm.xlu0 %1788, %v299_v0   ;;  %3186 = vst [vmem:[#allocation20_spill] sm:$0xff] %v2332_v8  ;;  %v357_v9 = vld [vmem:[%s2313_s12] sm:$0xff]  ;;  %v360_v12 = vld [vmem:[%s2313_s12 + $0x18] sm:$0xff]  ;;  %v2339_v13 = vld [vmem:[%s2305_s14 + $0x8] sm:$0xff]  ;;  %vm791_vm3 = vcmask 1043456   ;;  %vm794_vm4 = vcmask 1044480  }
  0x85   : > { %3187 = vst [vmem:[#allocation21_spill] sm:$0xff] %v2339_v13  ;;  %v2342_v14 = vld [vmem:[%s2305_s14 + $0x10] sm:$0xff]  ;;  %v298_v15 = vld [vmem:[%s2305_s14 + $0x18] sm:$0xff]  ;;  %v1610_v32 = vld [vmem:[%s2313_s12 + $0x20] sm:$0xff]  ;;  %vm797_vm5 = vcmask 1045504   ;;  %vm800_vm6 = vcmask 1046528  }
  0x86   : > { %3188 = vst [vmem:[#allocation22_spill] sm:$0xff] %v2342_v14  ;;  %v1612_v26 = vld [vmem:[%s2313_s12 + $0x30] sm:$0xff]  ;;  %v1613_v27 = vld [vmem:[%s2313_s12 + $0x38] sm:$0xff]  ;;  %v1611_v33 = vld [vmem:[%s2313_s12 + $0x28] sm:$0xff]  ;;  %s2638_s26 = sld [smem:[#allocation8]]  ;;  %s1609_s25 = sld [smem:[#allocation8 + $0x1]] }
  0x87   : > { %v2371_v54 = vld [vmem:[%s2313_s12 + $0x40] sm:$0xff]  ;;  %v2374_v59 = vld [vmem:[%s2313_s12 + $0x48] sm:$0xff]  ;;  %v2377_v60 = vld [vmem:[%s2313_s12 + $0x50] sm:$0xff]  ;;  %s1675_s5 = sshll.u32 %s2052_s18, 1  ;;  %s1676_s10 = sshll.u32 %s2056_s19, 3 }
  0x88   : > { %310 = vperm.xlu1 %1789, %v300_v3   ;;  %366 = vperm.xlu0 %1788, %v300_v3   ;;  %v2380_v61 = vld [vmem:[%s2313_s12 + $0x58] sm:$0xff]  ;;  %s3051_s18 = sadd.s32 %s1676_s10, %s1675_s5  ;;  %s3063_s19 = scalar_lea.vmem [#allocation9], %s1606_s22 }
  0x89   : > { %s1466_s24 = sshll.u32 %s3063_s19, 4  ;;  %s1677_s29 = sshll.u32 %s3051_s18, 7  ;;  %s3075_s24 = int_to_ptr.vmem [resolvable:$true] %s1466_s24 }
  0x8a   : > { %s3214_s3 = sld [smem:[#allocation35_spill]]  ;;  %s1451_s6 = scalar_lea.sflag [#allocation4], %s2299_s11 }
  0x8b   : > { %s1962_s22 = scalar_lea.vmem %s3075_s24, 512  ;;  %p3215_p1 = scmp.ne.s32.totalorder %s3173_s28, 0 }
  0x8c   : > { %1791 = vset.pattern.permute.xlu1 %v2078_v4  ;;  %1790 = vset.pattern.permute.xlu0 %v2078_v4  ;;  %p1963_p3 = scmp.ne.s32.totalorder %s3075_s24, %s1962_s22  ;;  %s2081_s8 = smov [#allocation9]  }
  0x8d   : > { %392 = vperm.xlu1 %1791, %v300_v3   ;;  %388 = vperm.xlu0 %1790, %v299_v0  }
  0x8e   : > { %p1964_p9 = pnand %p1963_p3, %p3215_p1 }
  0x90   : > { %s3080_s9 = scalar_lea.hbm %s3214_s3, %s1677_s29  ;;  %p1965_p13 = pneg %p1964_p9 }
  0x91   : > { %1792 = vset.pattern.permute.xlu1 %v2079_v5  ;;  %1793 = vset.pattern.permute.xlu0 %v2079_v5 }
  0x92   : > { %332 = vperm.xlu1 %1792, %v299_v0   ;;  %336 = vperm.xlu0 %1793, %v300_v3  }
  0x96   : > { %1794 = vset.pattern.permute.xlu0 %v2078_v4 }
 0x103   : > { %v306_v6 = vpop.permute.xlu1 %305  ;;  %v2329_v7 = vpop.permute.xlu0 %362 }
 0x104   : > { %v369_v18 = vmul.f32 %v2329_v7, %v357_v9  ;;  %v370_v19 = vmul.f32 %v2329_v7, %v358_v10  ;;  %v313_v22 = vmul.f32 %v306_v6, %v2332_v8  ;;  %v314_v23 = vmul.f32 %v306_v6, %v2339_v13  ;;  %v2391_v6 = vld [vmem:[%s2313_s12 + $0x60] sm:$0xff] }
 0x105   : > { %v418_v44 = vmul.f32 %v1610_v32, %v2329_v7  ;;  %v419_v45 = vmul.f32 %v1611_v33, %v2329_v7  ;;  %v459_v2 = vmul.f32 %v2371_v54, %v2329_v7  ;;  %v460_v3 = vmul.f32 %v2374_v59, %v2329_v7 }
 0x107   : > { %v311_v16 = vpop.permute.xlu1 %310  ;;  %v2345_v17 = vpop.permute.xlu0 %366 }
 0x108   : > { %v371_v20 = vmul.f32 %v2345_v17, %v359_v11  ;;  %v372_v21 = vmul.f32 %v2345_v17, %v360_v12  ;;  %v315_v24 = vmul.f32 %v311_v16, %v2342_v14  ;;  %v316_v25 = vmul.f32 %v311_v16, %v298_v15  ;;  %v2394_v15 = vld [vmem:[%s2313_s12 + $0x68] sm:$0xff]  ;;  %v2397_v16 = vld [vmem:[%s2313_s12 + $0x80] sm:$0xff] }
 0x109   : > { %v420_v34 = vmul.f32 %v1612_v26, %v2345_v17  ;;  %v421_v35 = vmul.f32 %v1613_v27, %v2345_v17  ;;  %v461_v4 = vmul.f32 %v2377_v60, %v2345_v17  ;;  %v462_v5 = vmul.f32 %v2380_v61, %v2345_v17 }
 0x10a   : > { %v373_v28 = vadd.f32 %v371_v20, %v369_v18  ;;  %v380_v29 = vadd.f32 %v372_v21, %v370_v19  ;;  %v317_v36 = vadd.f32 %v315_v24, %v313_v22  ;;  %v324_v37 = vadd.f32 %v316_v25, %v314_v23  ;;  %v2400_v18 = vld [vmem:[%s2313_s12 + $0x88] sm:$0xff] }
 0x10b   : > { %v422_v48 = vadd.f32 %v420_v34, %v418_v44  ;;  %v429_v49 = vadd.f32 %v421_v35, %v419_v45  ;;  %v501_v34 = vmul.f32 %v2394_v15, %v2329_v7  ;;  %v2412_v35 = vmul.f32 %v2397_v16, %v2329_v7 }
 0x10c   : > { %v2356_v30 = vpop.permute.xlu1 %392  ;;  %v2358_v31 = vpop.permute.xlu0 %388  ;;  %v374_v38 = vrot.slane %v373_v28, 4  ;;  %v381_v39 = vrot.slane %v380_v29, 4  ;;  %v318_v46 = vrot.slane %v317_v36, 4  ;;  %v325_v47 = vrot.slane %v324_v37, 4 }
 0x10d   : > { %v395_v40 = vmul.f32 %v2358_v31, %v357_v9  ;;  %v396_v41 = vmul.f32 %v2358_v31, %v358_v10  ;;  %v397_v42 = vmul.f32 %v2356_v30, %v359_v11  ;;  %v398_v43 = vmul.f32 %v2356_v30, %v360_v12 }
 0x10e   : > { %v375_v50 = vadd.f32 %v374_v38, %v373_v28  ;;  %v382_v51 = vadd.f32 %v381_v39, %v380_v29  ;;  %v319_v55 = vadd.f32 %v318_v46, %v317_v36  ;;  %v326_v56 = vadd.f32 %v325_v47, %v324_v37  ;;  %v2426_v38 = vld [vmem:[%s2313_s12 + $0xa8] sm:$0xff]  ;;  %v2429_v39 = vld [vmem:[%s2313_s12 + $0xc0] sm:$0xff] }
 0x10f   : > { %v399_v52 = vadd.f32 %v397_v42, %v395_v40  ;;  %v406_v53 = vadd.f32 %v398_v43, %v396_v41  ;;  %v423_v57 = vrot.slane %v422_v48, 4  ;;  %v430_v58 = vrot.slane %v429_v49, 4  ;;  %v2432_v40 = vld [vmem:[%s2313_s12 + $0xc8] sm:$0xff] }
 0x110   : > { %v376_v62 = vrot.slane %v375_v50, 2  ;;  %v383_v63 = vrot.slane %v382_v51, 2  ;;  %v320_v9 = vrot.slane %v319_v55, 2  ;;  %v327_v10 = vrot.slane %v326_v56, 2 }
 0x111   : > { %v400_v0 = vrot.slane %v399_v52, 4  ;;  %v407_v1 = vrot.slane %v406_v53, 4  ;;  %v424_v11 = vadd.f32 %v423_v57, %v422_v48  ;;  %v431_v12 = vadd.f32 %v430_v58, %v429_v49 }
 0x112   : > { %v377_v19 = vadd.f32 %v376_v62, %v375_v50  ;;  %v384_v20 = vadd.f32 %v383_v63, %v382_v51  ;;  %v436_v23 = vmul.f32 %v1610_v32, %v2358_v31  ;;  %v437_v24 = vmul.f32 %v1611_v33, %v2358_v31  ;;  %v2419_v32 = vld [vmem:[%s2313_s12 + $0xa0] sm:$0xff] }
 0x113   : > { %v401_v21 = vadd.f32 %v400_v0, %v399_v52  ;;  %v408_v22 = vadd.f32 %v407_v1, %v406_v53  ;;  %v438_v25 = vmul.f32 %v1612_v26, %v2356_v30  ;;  %v439_v28 = vmul.f32 %v1613_v27, %v2356_v30  ;;  %v1620_v1 = vld [vmem:[%s2313_s12 + $0x70] sm:$0xff] }
 0x114   : > { %v500_v29 = vmul.f32 %v2391_v6, %v2329_v7  ;;  %v2416_v36 = vmul.f32 %v2400_v18, %v2329_v7  ;;  %v2421_v33 = vadd.f32 %v320_v9, %v319_v55  ;;  %v2423_v26 = vadd.f32 %v327_v10, %v326_v56 }
 0x115   : > { %v425_v27 = vrot.slane %v424_v11, 2  ;;  %v432_v37 = vrot.slane %v431_v12, 2  ;;  %v402_v41 = vrot.slane %v401_v21, 2  ;;  %v409_v42 = vrot.slane %v408_v22, 2 }
 0x116   : > { %3189 = vst [vmem:[#allocation23_spill] sm:$0xff] %v2421_v33  ;;  %3190 = vst [vmem:[#allocation24_spill] sm:$0xff] %v2423_v26  ;;  %v463_v43 = vadd.f32 %v461_v4, %v459_v2  ;;  %v470_v44 = vadd.f32 %v462_v5, %v460_v3  ;;  %v378_v45 = vrot.slane %v377_v19, 1  ;;  %v385_v46 = vrot.slane %v384_v20, 1  ;;  %v1621_v2 = vld [vmem:[%s2313_s12 + $0x78] sm:$0xff] }
 0x117   : > { %v440_v47 = vadd.f32 %v438_v25, %v436_v23  ;;  %v447_v48 = vadd.f32 %v439_v28, %v437_v24  ;;  %v2436_v49 = vmul.f32 %v2419_v32, %v2329_v7  ;;  %v2440_v50 = vmul.f32 %v2426_v38, %v2329_v7 }
 0x118   : > { %v2444_v51 = vmul.f32 %v2429_v39, %v2329_v7  ;;  %v2448_v52 = vmul.f32 %v2432_v40, %v2329_v7  ;;  %v426_v56 = vadd.f32 %v425_v27, %v424_v11  ;;  %v433_v57 = vadd.f32 %v432_v37, %v431_v12 }
 0x119   : > { %v403_v58 = vadd.f32 %v402_v41, %v401_v21  ;;  %v410_v62 = vadd.f32 %v409_v42, %v408_v22  ;;  %v464_v63 = vrot.slane %v463_v43, 4  ;;  %v471_v0 = vrot.slane %v470_v44, 4  ;;  %v1624_v41 = vld [vmem:[%s2313_s12 + $0x90] sm:$0xff] }
 0x11a   : > { %v2454_v3 = vadd.f32 %v378_v45, %v377_v19  ;;  %v2456_v4 = vadd.f32 %v385_v46, %v384_v20  ;;  %v441_v5 = vrot.slane %v440_v47, 4  ;;  %v448_v9 = vrot.slane %v447_v48, 4 }
 0x11b   : > { %v477_v10 = vmul.f32 %v2371_v54, %v2358_v31  ;;  %v478_v11 = vmul.f32 %v2374_v59, %v2358_v31  ;;  %v479_v12 = vmul.f32 %v2377_v60, %v2356_v30  ;;  %v480_v21 = vmul.f32 %v2380_v61, %v2356_v30  ;;  %v1625_v61 = vld [vmem:[%s2313_s12 + $0x98] sm:$0xff] }
 0x11c   : > { %v427_v19 = vrot.slane %v426_v56, 1  ;;  %v434_v22 = vrot.slane %v433_v57, 1  ;;  %v502_v20 = vmul.f32 %v1620_v1, %v2345_v17  ;;  %v503_v23 = vmul.f32 %v1621_v2, %v2345_v17 }
 0x11d   : > { %v404_v24 = vrot.slane %v403_v58, 1  ;;  %v411_v25 = vrot.slane %v410_v62, 1  ;;  %v465_v54 = vadd.f32 %v464_v63, %v463_v43  ;;  %v472_v28 = vadd.f32 %v471_v0, %v470_v44 }
 0x11e   : > { %v442_v27 = vadd.f32 %v441_v5, %v440_v47  ;;  %v449_v37 = vadd.f32 %v448_v9, %v447_v48  ;;  %v518_v59 = vmul.f32 %v2391_v6, %v2358_v31  ;;  %v519_v60 = vmul.f32 %v2394_v15, %v2358_v31 }
 0x11f   : > { %v481_v42 = vadd.f32 %v479_v12, %v477_v10  ;;  %v488_v45 = vadd.f32 %v480_v21, %v478_v11  ;;  %v520_v46 = vmul.f32 %v1620_v1, %v2356_v30  ;;  %v521_v55 = vmul.f32 %v1621_v2, %v2356_v30  ;;  %v2487_v11 = vld [vmem:[%s2313_s12 + $0xb0] sm:$0xff] }
 0x120   : > { %v2476_v53 = vadd.f32 %v427_v19, %v426_v56  ;;  %v2478_v43 = vadd.f32 %v434_v22, %v433_v57  ;;  %v504_v44 = vadd.f32 %v502_v20, %v500_v29  ;;  %v511_v47 = vadd.f32 %v503_v23, %v501_v34  ;;  %v2490_v29 = vld [vmem:[%s2313_s12 + $0xb8] sm:$0xff] }
 0x121   : > { %v2480_v6 = vadd.f32 %v404_v24, %v403_v58  ;;  %v2482_v48 = vadd.f32 %v411_v25, %v410_v62  ;;  %v543_v15 = vmul.f32 %v1624_v41, %v2345_v17  ;;  %v544_v63 = vmul.f32 %v1625_v61, %v2345_v17 }
 0x122   : > { %v466_v0 = vrot.slane %v465_v54, 2  ;;  %v473_v1 = vrot.slane %v472_v28, 2  ;;  %v522_v5 = vadd.f32 %v520_v46, %v518_v59  ;;  %v529_v2 = vadd.f32 %v521_v55, %v519_v60 }
 0x123   : > { %3191 = vst [vmem:[#allocation25_spill] sm:$0xff] %v2480_v6  ;;  %3192 = vst [vmem:[#allocation26_spill] sm:$0xff] %v2482_v48  ;;  %v443_v56 = vrot.slane %v442_v27, 2  ;;  %v450_v9 = vrot.slane %v449_v37, 2  ;;  %v482_v10 = vrot.slane %v481_v42, 4  ;;  %v489_v57 = vrot.slane %v488_v45, 4 }
 0x124   : > { %v505_v34 = vrot.slane %v504_v44, 4  ;;  %v512_v58 = vrot.slane %v511_v47, 4  ;;  %v559_v62 = vmul.f32 %v2397_v16, %v2358_v31  ;;  %v560_v12 = vmul.f32 %v2400_v18, %v2358_v31 }
 0x125   : > { %v545_v21 = vadd.f32 %v543_v15, %v2412_v35  ;;  %v552_v55 = vadd.f32 %v544_v63, %v2416_v36  ;;  %v561_v19 = vmul.f32 %v1624_v41, %v2356_v30  ;;  %v562_v22 = vmul.f32 %v1625_v61, %v2356_v30 }
 0x126   : > { %v523_v20 = vrot.slane %v522_v5, 4  ;;  %v530_v23 = vrot.slane %v529_v2, 4  ;;  %v584_v24 = vmul.f32 %v2487_v11, %v2345_v17  ;;  %v585_v25 = vmul.f32 %v2490_v29, %v2345_v17 }
 0x127   : > { %v444_v16 = vadd.f32 %v443_v56, %v442_v27  ;;  %v451_v59 = vadd.f32 %v450_v9, %v449_v37  ;;  %v467_v60 = vadd.f32 %v466_v0, %v465_v54  ;;  %v474_v18 = vadd.f32 %v473_v1, %v472_v28 }
 0x128   : > { %v483_v46 = vadd.f32 %v482_v10, %v481_v42  ;;  %v490_v35 = vadd.f32 %v489_v57, %v488_v45  ;;  %v563_v15 = vadd.f32 %v561_v19, %v559_v62  ;;  %v570_v36 = vadd.f32 %v562_v22, %v560_v12 }
 0x129   : > { %v506_v63 = vadd.f32 %v505_v34, %v504_v44  ;;  %v513_v41 = vadd.f32 %v512_v58, %v511_v47  ;;  %v546_v14 = vrot.slane %v545_v21, 4  ;;  %v553_v61 = vrot.slane %v552_v55, 4 }
 0x12a   : > { %v524_v13 = vadd.f32 %v523_v20, %v522_v5  ;;  %v531_v8 = vadd.f32 %v530_v23, %v529_v2  ;;  %v586_v26 = vadd.f32 %v584_v24, %v2436_v49  ;;  %v593_v33 = vadd.f32 %v585_v25, %v2440_v50 }
 0x12b   : > { %v445_v48 = vrot.slane %v444_v16, 1  ;;  %v452_v6 = vrot.slane %v451_v59, 1  ;;  %v468_v27 = vrot.slane %v467_v60, 1  ;;  %v475_v37 = vrot.slane %v474_v18, 1 }
 0x12c   : > { %v484_v54 = vrot.slane %v483_v46, 2  ;;  %v491_v28 = vrot.slane %v490_v35, 2  ;;  %v564_v42 = vrot.slane %v563_v15, 4  ;;  %v571_v45 = vrot.slane %v570_v36, 4 }
 0x12d   : > { %v507_v0 = vrot.slane %v506_v63, 2  ;;  %v514_v1 = vrot.slane %v513_v41, 2  ;;  %v547_v44 = vadd.f32 %v546_v14, %v545_v21  ;;  %v554_v47 = vadd.f32 %v553_v61, %v552_v55 }
 0x12e   : > { %v525_v56 = vrot.slane %v524_v13, 2  ;;  %v532_v9 = vrot.slane %v531_v8, 2  ;;  %v587_v5 = vrot.slane %v586_v26, 4  ;;  %v594_v2 = vrot.slane %v593_v33, 4 }
 0x12f   : > { %v2506_v10 = vadd.f32 %v445_v48, %v444_v16  ;;  %v2508_v49 = vadd.f32 %v452_v6, %v451_v59  ;;  %v2510_v50 = vadd.f32 %v468_v27, %v467_v60  ;;  %v2512_v57 = vadd.f32 %v475_v37, %v474_v18  ;;  %v1632_v59 = vld [vmem:[%s2313_s12 + $0xd0] sm:$0xff]  ;;  %v1633_v60 = vld [vmem:[%s2313_s12 + $0xd8] sm:$0xff] }
 0x130   : > { %v485_v34 = vadd.f32 %v484_v54, %v483_v46  ;;  %v492_v58 = vadd.f32 %v491_v28, %v490_v35  ;;  %v565_v62 = vadd.f32 %v564_v42, %v563_v15  ;;  %v572_v12 = vadd.f32 %v571_v45, %v570_v36 }
 0x131   : > { %v508_v14 = vadd.f32 %v507_v0, %v506_v63  ;;  %v515_v21 = vadd.f32 %v514_v1, %v513_v41  ;;  %v548_v55 = vrot.slane %v547_v44, 2  ;;  %v555_v19 = vrot.slane %v554_v47, 2 }
 0x132   : > { %v526_v22 = vadd.f32 %v525_v56, %v524_v13  ;;  %v533_v20 = vadd.f32 %v532_v9, %v531_v8  ;;  %v588_v48 = vadd.f32 %v587_v5, %v586_v26  ;;  %v595_v23 = vadd.f32 %v594_v2, %v593_v33  ;;  %v1636_v5 = vld [vmem:[%s2313_s12 + $0xf0] sm:$0xff]  ;;  %v1637_v2 = vld [vmem:[%s2313_s12 + $0xf8] sm:$0xff] }
 0x133   : > { %v600_v6 = vmul.f32 %v2419_v32, %v2358_v31  ;;  %v601_v24 = vmul.f32 %v2426_v38, %v2358_v31  ;;  %v602_v25 = vmul.f32 %v2487_v11, %v2356_v30  ;;  %v603_v16 = vmul.f32 %v2490_v29, %v2356_v30 }
 0x134   : > { %v486_v18 = vrot.slane %v485_v34, 1  ;;  %v493_v46 = vrot.slane %v492_v58, 1  ;;  %v566_v13 = vrot.slane %v565_v62, 2  ;;  %v573_v8 = vrot.slane %v572_v12, 2 }
 0x135   : > { %v509_v26 = vrot.slane %v508_v14, 1  ;;  %v516_v33 = vrot.slane %v515_v21, 1  ;;  %v549_v35 = vadd.f32 %v548_v55, %v547_v44  ;;  %v556_v15 = vadd.f32 %v555_v19, %v554_v47 }
 0x136   : > { %v527_v32 = vrot.slane %v526_v22, 1  ;;  %v534_v36 = vrot.slane %v533_v20, 1  ;;  %v625_v38 = vmul.f32 %v1632_v59, %v2345_v17  ;;  %v626_v63 = vmul.f32 %v1633_v60, %v2345_v17 }
 0x137   : > { %v589_v11 = vrot.slane %v588_v48, 2  ;;  %v596_v41 = vrot.slane %v595_v23, 2  ;;  %v604_v29 = vadd.f32 %v602_v25, %v600_v6  ;;  %v611_v61 = vadd.f32 %v603_v16, %v601_v24 }
 0x138   : > { %v2526_v27 = vadd.f32 %v486_v18, %v485_v34  ;;  %v2528_v37 = vadd.f32 %v493_v46, %v492_v58  ;;  %v567_v54 = vadd.f32 %v566_v13, %v565_v62  ;;  %v574_v28 = vadd.f32 %v573_v8, %v572_v12 }
 0x139   : > { %v2530_v42 = vadd.f32 %v509_v26, %v508_v14  ;;  %v2532_v45 = vadd.f32 %v516_v33, %v515_v21  ;;  %v550_v0 = vrot.slane %v549_v35, 1  ;;  %v557_v1 = vrot.slane %v556_v15, 1  ;;  %v2563_v26 = vld [vmem:[%s2313_s12 + $0x100] sm:$0xff] }
 0x13a   : > { %v2534_v44 = vadd.f32 %v527_v32, %v526_v22  ;;  %v2536_v47 = vadd.f32 %v534_v36, %v533_v20  ;;  %v627_v56 = vadd.f32 %v625_v38, %v2444_v51  ;;  %v634_v9 = vadd.f32 %v626_v63, %v2448_v52  ;;  %v1634_v22 = vld [vmem:[%s2313_s12 + $0xe0] sm:$0xff]  ;;  %v1635_v20 = vld [vmem:[%s2313_s12 + $0xe8] sm:$0xff]  ;;  %v2569_v38 = vld [vmem:[%s2313_s12 + $0x110] sm:$0xff] }
 0x13b   : > { %v590_v34 = vadd.f32 %v589_v11, %v588_v48  ;;  %v597_v58 = vadd.f32 %v596_v41, %v595_v23  ;;  %v605_v62 = vrot.slane %v604_v29, 4  ;;  %v612_v12 = vrot.slane %v611_v61, 4  ;;  %v2566_v36 = vld [vmem:[%s2313_s12 + $0x108] sm:$0xff]  ;;  %3194 = vst [vmem:[#allocation28_spill] sm:$0xff] %v2569_v38  ;;  %v2572_v63 = vld [vmem:[%s2313_s12 + $0x118] sm:$0xff] }
 0x13c   : > { %v568_v14 = vrot.slane %v567_v54, 1  ;;  %v575_v21 = vrot.slane %v574_v28, 1  ;;  %v641_v55 = vmul.f32 %v2429_v39, %v2358_v31  ;;  %v642_v19 = vmul.f32 %v2432_v40, %v2358_v31  ;;  %3193 = vst [vmem:[#allocation27_spill] sm:$0xff] %v2566_v36  ;;  %3195 = vst [vmem:[#allocation29_spill] sm:$0xff] %v2572_v63 }
 0x13d   : > { %v643_v51 = vmul.f32 %v1632_v59, %v2356_v30  ;;  %v644_v52 = vmul.f32 %v1633_v60, %v2356_v30  ;;  %v666_v48 = vmul.f32 %v1636_v5, %v2345_v17  ;;  %v667_v23 = vmul.f32 %v1637_v2, %v2345_v17 }
 0x13e   : > { %v2552_v6 = vadd.f32 %v550_v0, %v549_v35  ;;  %v2554_v24 = vadd.f32 %v557_v1, %v556_v15  ;;  %v628_v39 = vrot.slane %v627_v56, 4  ;;  %v635_v25 = vrot.slane %v634_v9, 4 }
 0x13f   : > { %v606_v40 = vadd.f32 %v605_v62, %v604_v29  ;;  %v613_v16 = vadd.f32 %v612_v12, %v611_v61  ;;  %v664_v59 = vmul.f32 %v1634_v22, %v2329_v7  ;;  %v665_v18 = vmul.f32 %v1635_v20, %v2329_v7 }
 0x140   : > { %v2558_v60 = vadd.f32 %v568_v14, %v567_v54  ;;  %v2560_v46 = vadd.f32 %v575_v21, %v574_v28  ;;  %v591_v13 = vrot.slane %v590_v34, 1  ;;  %v598_v8 = vrot.slane %v597_v58, 1 }
 0x141   : > { %v645_v33 = vadd.f32 %v643_v51, %v641_v55  ;;  %v652_v35 = vadd.f32 %v644_v52, %v642_v19  ;;  %v668_v15 = vadd.f32 %v666_v48, %v664_v59  ;;  %v675_v32 = vadd.f32 %v667_v23, %v665_v18 }
 0x142   : > { %v682_v11 = vmul.f32 %v1634_v22, %v2358_v31  ;;  %v683_v41 = vmul.f32 %v1635_v20, %v2358_v31  ;;  %v684_v29 = vmul.f32 %v1636_v5, %v2356_v30  ;;  %v685_v61 = vmul.f32 %v1637_v2, %v2356_v30 }
 0x143   : > { %v607_v54 = vrot.slane %v606_v40, 2  ;;  %v614_v28 = vrot.slane %v613_v16, 2  ;;  %v629_v0 = vadd.f32 %v628_v39, %v627_v56  ;;  %v636_v1 = vadd.f32 %v635_v25, %v634_v9  ;;  %v2591_v39 = vld [vmem:[%s2313_s12 + $0x120] sm:$0xff]  ;;  %v2594_v25 = vld [vmem:[%s2313_s12 + $0x128] sm:$0xff] }
 0x144   : > { %v705_v62 = vmul.f32 %v2563_v26, %v2329_v7  ;;  %v706_v12 = vmul.f32 %v2566_v36, %v2329_v7  ;;  %v707_v14 = vmul.f32 %v2569_v38, %v2345_v17  ;;  %v708_v5 = vmul.f32 %v2572_v63, %v2345_v17  ;;  %3196 = vst [vmem:[#allocation30_spill] sm:$0xff] %v2594_v25  ;;  %v2597_v38 = vld [vmem:[%s2313_s12 + $0x130] sm:$0xff] }
 0x145   : > { %v646_v21 = vrot.slane %v645_v33, 4  ;;  %v653_v2 = vrot.slane %v652_v35, 4  ;;  %v669_v55 = vrot.slane %v668_v15, 4  ;;  %v676_v56 = vrot.slane %v675_v32, 4  ;;  %3197 = vst [vmem:[#allocation31_spill] sm:$0xff] %v2597_v38 }
 0x146   : > { %v686_v9 = vadd.f32 %v684_v29, %v682_v11  ;;  %v693_v19 = vadd.f32 %v685_v61, %v683_v41  ;;  %v709_v22 = vadd.f32 %v707_v14, %v705_v62  ;;  %v716_v20 = vadd.f32 %v708_v5, %v706_v12  ;;  %v2600_v11 = vld [vmem:[%s2313_s12 + $0x138] sm:$0xff] }
 0x147   : > { %v2586_v51 = vadd.f32 %v591_v13, %v590_v34  ;;  %v2588_v52 = vadd.f32 %v598_v8, %v597_v58  ;;  %v630_v48 = vrot.slane %v629_v0, 2  ;;  %v637_v23 = vrot.slane %v636_v1, 2  ;;  %3198 = vst [vmem:[#allocation32_spill] sm:$0xff] %v2600_v11 }
 0x148   : > { %v608_v59 = vadd.f32 %v607_v54, %v606_v40  ;;  %v615_v18 = vadd.f32 %v614_v28, %v613_v16  ;;  %v710_v63 = vrot.slane %v709_v22, 4  ;;  %v717_v36 = vrot.slane %v716_v20, 4 }
 0x149   : > { %v647_v41 = vadd.f32 %v646_v21, %v645_v33  ;;  %v654_v29 = vadd.f32 %v653_v2, %v652_v35  ;;  %v670_v34 = vadd.f32 %v669_v55, %v668_v15  ;;  %v677_v13 = vadd.f32 %v676_v56, %v675_v32 }
 0x14a   : > { %v687_v58 = vrot.slane %v686_v9, 4  ;;  %v694_v8 = vrot.slane %v693_v19, 4  ;;  %v746_v61 = vmul.f32 %v2591_v39, %v2329_v7  ;;  %v747_v40 = vmul.f32 %v2594_v25, %v2329_v7 }
 0x14b   : > { %v711_v16 = vadd.f32 %v710_v63, %v709_v22  ;;  %v718_v54 = vadd.f32 %v717_v36, %v716_v20  ;;  %v748_v28 = vmul.f32 %v2597_v38, %v2345_v17  ;;  %v749_v33 = vmul.f32 %v2600_v11, %v2345_v17 }
 0x14c   : > { %v609_v35 = vrot.slane %v608_v59, 1  ;;  %v616_v15 = vrot.slane %v615_v18, 1  ;;  %v631_v32 = vadd.f32 %v630_v48, %v629_v0  ;;  %v638_v62 = vadd.f32 %v637_v23, %v636_v1 }
 0x14d   : > { %v648_v12 = vrot.slane %v647_v41, 2  ;;  %v655_v14 = vrot.slane %v654_v29, 2  ;;  %v750_v5 = vadd.f32 %v748_v28, %v746_v61  ;;  %v757_v21 = vadd.f32 %v749_v33, %v747_v40 }
 0x14e   : > { %v671_v2 = vrot.slane %v670_v34, 2  ;;  %v678_v7 = vrot.slane %v677_v13, 2  ;;  %v688_v63 = vadd.f32 %v687_v58, %v686_v9  ;;  %v695_v36 = vadd.f32 %v694_v8, %v693_v19 }
 0x14f   : > { %v712_v55 = vrot.slane %v711_v16, 2  ;;  %v719_v56 = vrot.slane %v718_v54, 2  ;;  %v751_v22 = vrot.slane %v750_v5, 4  ;;  %v758_v20 = vrot.slane %v757_v21, 4 }
 0x150   : > { %v2610_v17 = vadd.f32 %v609_v35, %v608_v59  ;;  %v2612_v11 = vadd.f32 %v616_v15, %v615_v18  ;;  %v632_v0 = vrot.slane %v631_v32, 1  ;;  %v639_v1 = vrot.slane %v638_v62, 1 }
 0x151   : > { %v649_v48 = vadd.f32 %v648_v12, %v647_v41  ;;  %v656_v23 = vadd.f32 %v655_v14, %v654_v29  ;;  %v752_v61 = vadd.f32 %v751_v22, %v750_v5  ;;  %v759_v40 = vadd.f32 %v758_v20, %v757_v21  ;;  %v3200_v5 = vld [vmem:[#allocation26_spill] sm:$0xff] }
 0x152   : > { %v672_v28 = vadd.f32 %v671_v2, %v670_v34  ;;  %v679_v33 = vadd.f32 %v678_v7, %v677_v13  ;;  %v689_v9 = vrot.slane %v688_v63, 2  ;;  %v696_v19 = vrot.slane %v695_v36, 2 }
 0x153   : > { %v713_v58 = vadd.f32 %v712_v55, %v711_v16  ;;  %v720_v8 = vadd.f32 %v719_v56, %v718_v54  ;;  %v753_v25 = vrot.slane %v752_v61, 2  ;;  %v760_v38 = vrot.slane %v759_v40, 2 }
 0x154   : > { %v633_v59 = vadd.f32 %v632_v0, %v631_v32  ;;  %v640_v35 = vadd.f32 %v639_v1, %v638_v62  ;;  %v783_v18 = vsel %vm782_vm0, %v2454_v3, %v2476_v53  ;;  %v784_v41 = vsel %vm782_vm0, %v2456_v4, %v2478_v43 }
 0x155   : > { %v650_v29 = vrot.slane %v649_v48, 1  ;;  %v657_v34 = vrot.slane %v656_v23, 1  ;;  %v754_v13 = vadd.f32 %v753_v25, %v752_v61  ;;  %v761_v15 = vadd.f32 %v760_v38, %v759_v40  ;;  %v3199_v38 = vld [vmem:[#allocation25_spill] sm:$0xff] }
 0x156   : > { %v690_v12 = vadd.f32 %v689_v9, %v688_v63  ;;  %v697_v16 = vadd.f32 %v696_v19, %v695_v36  ;;  %v786_v54 = vsel %vm785_vm1, %v783_v18, %v2510_v50  ;;  %v787_v32 = vsel %vm785_vm1, %v784_v41, %v2512_v57 }
 0x157   : > { %v673_v62 = vrot.slane %v672_v28, 1  ;;  %v680_v14 = vrot.slane %v679_v33, 1  ;;  %v714_v53 = vrot.slane %v713_v58, 1  ;;  %v721_v3 = vrot.slane %v720_v8, 1 }
 0x158   : > { %v789_v4 = vsel %vm788_vm2, %v786_v54, %v2530_v42  ;;  %v790_v43 = vsel %vm788_vm2, %v787_v32, %v2532_v45  ;;  %v805_v25 = vsel %vm782_vm0, %v3199_v38, %v2506_v10  ;;  %v806_v50 = vsel %vm782_vm0, %v3200_v5, %v2508_v49 }
 0x159   : > { %v651_v21 = vadd.f32 %v650_v29, %v649_v48  ;;  %v658_v57 = vadd.f32 %v657_v34, %v656_v23  ;;  %v755_v2 = vrot.slane %v754_v13, 1  ;;  %v762_v7 = vrot.slane %v761_v15, 1 }
 0x15a   : > { %v691_v63 = vrot.slane %v690_v12, 1  ;;  %v698_v36 = vrot.slane %v697_v16, 1  ;;  %v792_v42 = vsel %vm791_vm3, %v789_v4, %v2552_v6  ;;  %v793_v45 = vsel %vm791_vm3, %v790_v43, %v2554_v24 }
 0x15b   : > { %v795_v10 = vsel %vm794_vm4, %v792_v42, %v2586_v51  ;;  %v796_v49 = vsel %vm794_vm4, %v793_v45, %v2588_v52  ;;  %v807_v55 = vsel %vm785_vm1, %v805_v25, %v2526_v27  ;;  %v808_v56 = vsel %vm785_vm1, %v806_v50, %v2528_v37  ;;  %v3201_v37 = vld [vmem:[#allocation23_spill] sm:$0xff] }
 0x15c   : > { %v674_v22 = vadd.f32 %v673_v62, %v672_v28  ;;  %v681_v20 = vadd.f32 %v680_v14, %v679_v33  ;;  %v715_v6 = vadd.f32 %v714_v53, %v713_v58  ;;  %v722_v0 = vadd.f32 %v721_v3, %v720_v8  ;;  %v3203_v33 = vld [vmem:[#allocation24_spill] sm:$0xff] }
 0x15d   : > { %v756_v1 = vadd.f32 %v755_v2, %v754_v13  ;;  %v763_v24 = vadd.f32 %v762_v7, %v761_v15  ;;  %v798_v48 = vsel %vm797_vm5, %v795_v10, %v633_v59  ;;  %v799_v23 = vsel %vm797_vm5, %v796_v49, %v640_v35  ;;  %v3206_v10 = vld [vmem:[#allocation27_spill] sm:$0xff] }
 0x15e   : > { %v692_v51 = vadd.f32 %v691_v63, %v690_v12  ;;  %v699_v61 = vadd.f32 %v698_v36, %v697_v16  ;;  %v809_v52 = vsel %vm788_vm2, %v807_v55, %v2534_v44  ;;  %v810_v27 = vsel %vm788_vm2, %v808_v56, %v2536_v47  ;;  %v3205_v36 = vld [vmem:[#allocation28_spill] sm:$0xff]  ;;  %v3207_v55 = vld [vmem:[#allocation29_spill] sm:$0xff] }
 0x15f   : > { %v3202_v40 = vrot.slane %v3201_v37, 1  ;;  %v3204_v9 = vrot.slane %v3203_v33, 1  ;;  %v811_v58 = vsel %vm791_vm3, %v809_v52, %v2558_v60  ;;  %v812_v8 = vsel %vm791_vm3, %v810_v27, %v2560_v46 }
 0x160   : > { %v801_v44 = vsel %vm800_vm6, %v798_v48, %v674_v22  ;;  %v802_v59 = vsel %vm800_vm6, %v799_v23, %v681_v20  ;;  %v813_v47 = vsel %vm794_vm4, %v811_v58, %v2610_v17  ;;  %v814_v35 = vsel %vm794_vm4, %v812_v8, %v2612_v11  ;;  %v3208_v20 = vld [vmem:[#allocation31_spill] sm:$0xff] }
 0x161   : > { %v323_v28 = vadd.f32 %v3202_v40, %v3201_v37  ;;  %v330_v19 = vadd.f32 %v3204_v9, %v3203_v33  ;;  %v803_v18 = vsel %vm782_vm0, %v715_v6, %v756_v1  ;;  %v804_v41 = vsel %vm782_vm0, %v722_v0, %v763_v24  ;;  %v3210_v24 = vld [vmem:[#allocation32_spill] sm:$0xff] }
 0x162   : > { %v815_v29 = vsel %vm797_vm5, %v813_v47, %v651_v21  ;;  %v816_v60 = vsel %vm797_vm5, %v814_v35, %v658_v57  ;;  %v825_v13 = vstv %s2638_s26  ;;  %v723_v63 = vmul.f32 %v2563_v26, %v2358_v31  ;;  %v3209_v26 = vld [vmem:[#allocation30_spill] sm:$0xff] }
 0x163   : > { %v2675_v46 = vsel %vm800_vm6, %v815_v29, %v692_v51  ;;  %v2678_v34 = vsel %vm800_vm6, %v816_v60, %v699_v61  ;;  %v821_v15 = vadd.f32 %v801_v44, %v323_v28  ;;  %v822_v17 = vadd.f32 %v802_v59, %v330_v19  ;;  %v333_v60 = vpop.permute.xlu1 %332 }
 0x164   : > { %v823_v12 = vadd.f32 %v803_v18, %v323_v28  ;;  %v824_v16 = vadd.f32 %v804_v41, %v330_v19  ;;  %v725_v42 = vmul.f32 %v3205_v36, %v2356_v30  ;;  %v724_v49 = vmul.f32 %v3206_v10, %v2358_v31 }
 0x165   : > { %v826_v11 = vadd.f32 %v825_v13, %v821_v15  ;;  %v827_v54 = vadd.f32 %v825_v13, %v822_v17  ;;  %v726_v56 = vmul.f32 %v3207_v55, %v2356_v30  ;;  %v764_v22 = vmul.f32 %v2591_v39, %v2358_v31 }
 0x166   : > { %v828_v32 = vadd.f32 %v825_v13, %v823_v12  ;;  %v829_v62 = vadd.f32 %v825_v13, %v824_v16  ;;  %v766_v6 = vmul.f32 %v3208_v20, %v2356_v30  ;;  %v765_v1 = vmul.f32 %v3209_v26, %v2358_v31 }
 0x167   : > { %v1646_v14 = vmul.f32 -1.442695, %v826_v11  ;;  %v1647_v53 = vmul.f32 -1.442695, %v827_v54  ;;  %v767_v48 = vmul.f32 %v3210_v24, %v2356_v30  ;;  %v727_v61 = vadd.f32 %v725_v42, %v723_v63  ;;  %v337_v54 = vpop.permute.xlu0 %336 }
 0x168   : > { %v1648_v3 = vmul.f32 -1.442695, %v828_v32  ;;  %v1649_v4 = vmul.f32 -1.442695, %v829_v62  ;;  %v734_v27 = vadd.f32 %v726_v56, %v724_v49  ;;  %v768_v37 = vadd.f32 %v766_v6, %v764_v22  ;;  %v3211_v62 = vld [vmem:[#allocation20_spill] sm:$0xff]  ;;  %v2730_v6 = vld [vmem:[%s2305_s14 + $0x18] sm:$0xff] }
 0x169   : > { %1795 = vpow2.f32 %v1646_v14  ;;  %v775_v28 = vadd.f32 %v767_v48, %v765_v1  ;;  %v854_v33 = vlaneseq  ;;  %v728_v30 = vrot.slane %v727_v61, 4 }
 0x16a   : > { %1797 = vpow2.f32 %v1647_v53  ;;  %v735_v58 = vrot.slane %v734_v27, 4  ;;  %v769_v8 = vrot.slane %v768_v37, 4  ;;  %v339_v14 = vmul.f32 %v333_v60, %v3211_v62 }
 0x16b   : > { %1799 = vpow2.f32 %v1648_v3  ;;  %v776_v59 = vrot.slane %v775_v28, 4  ;;  %v2711_v35 = vshrl.u32 %v854_v33, 7  ;;  %v729_v41 = vadd.f32 %v728_v30, %v727_v61 }
 0x16c   : > { %1801 = vpow2.f32 %v1649_v4  ;;  %v736_v13 = vadd.f32 %v735_v58, %v734_v27  ;;  %v770_v15 = vadd.f32 %v769_v8, %v768_v37  ;;  %v3212_v4 = vld [vmem:[#allocation21_spill] sm:$0xff]  ;;  %v342_v26 = vmul.f32 %v2730_v6, %v337_v54 }
 0x16d   : > { %v777_v12 = vadd.f32 %v776_v59, %v775_v28  ;;  %v2714_v11 = vadd.s32 8, %v2711_v35  ;;  %v730_v53 = vrot.slane %v729_v41, 2 }
 0x16f   : > { %v731_v36 = vadd.f32 %v730_v53, %v729_v41 }
 0x173   : > { %v1796_v43 = vpop.eup %1795 }
 0x174   : > { %v1798_v38 = vpop.eup %1797  ;;  %v842_v25 = vadd.f32 1.0, %v1796_v43  ;;  %v340_v43 = vmul.f32 %v333_v60, %v3212_v4 }
 0x175   : > { %v1800_v5 = vpop.eup %1799  ;;  %v843_v50 = vadd.f32 1.0, %v1798_v38  ;;  %v737_v38 = vrot.slane %v736_v13, 2 }
 0x176   : > { %v1802_v21 = vpop.eup %1801  ;;  %v844_v57 = vadd.f32 1.0, %v1800_v5  ;;  %1803 = vrcp.f32 %v842_v25  ;;  %v771_v25 = vrot.slane %v770_v15, 2 }
 0x177   : > { %v845_v2 = vadd.f32 1.0, %v1802_v21  ;;  %1805 = vrcp.f32 %v843_v50  ;;  %v778_v50 = vrot.slane %v777_v12, 2  ;;  %v3213_v21 = vld [vmem:[#allocation22_spill] sm:$0xff]  ;;  %v738_v55 = vadd.f32 %v737_v38, %v736_v13 }
 0x178   : > { %1807 = vrcp.f32 %v844_v57  ;;  %v341_v57 = vmul.f32 %v337_v54, %v3213_v21  ;;  %v772_v56 = vadd.f32 %v771_v25, %v770_v15 }
 0x179   : > { %1809 = vrcp.f32 %v845_v2  ;;  %v779_v20 = vadd.f32 %v778_v50, %v777_v12 }
 0x17a   : > { %v343_v24 = vadd.f32 %v341_v57, %v339_v14  ;;  %v773_v27 = vrot.slane %v772_v56, 1 }
 0x17b   : > { %v780_v37 = vrot.slane %v779_v20, 1 }
 0x17c   : > { %v774_v8 = vadd.f32 %v773_v27, %v772_v56 }
 0x180   : > { %v2681_v7 = vpop.eup %1803 }
 0x181   : > { %v2687_v45 = vpop.eup %1805 }
 0x182   : > { %v2697_v0 = vpop.eup %1807 }
 0x183   : > { %v2703_v23 = vpop.eup %1809  ;;  %v857_v51 = vsel %vm785_vm1, %v2697_v0, -inf }
 0x184   : > { %v858_v52 = vmax.f32 %v2681_v7, %v857_v51  ;;  %v865_v39 = vsel %vm785_vm1, %v2703_v23, -inf }
 0x185   : > { %v866_v40 = vmax.f32 %v2687_v45, %v865_v39  ;;  %v739_v39 = vrot.slane %v738_v55, 1 }
 0x186   : > { %v859_v31 = vrot.slane %v858_v52, 4 }
 0x187   : > { %v867_v9 = vrot.slane %v866_v40, 4  ;;  %v740_v58 = vadd.f32 %v739_v39, %v738_v55 }
 0x188   : > { %v860_v19 = vmax.f32 %v858_v52, %v859_v31  ;;  %v732_v52 = vrot.slane %v731_v36, 1  ;;  %v344_v31 = vrot.slane %v343_v24, 4 }
 0x189   : > { %v868_v44 = vmax.f32 %v866_v40, %v867_v9  ;;  %v350_v40 = vadd.f32 %v342_v26, %v340_v43 }
 0x18a   : > { %v861_v47 = vrot.slane %v860_v19, 2 }
 0x18b   : > { %v869_v18 = vrot.slane %v868_v44, 2  ;;  %v351_v59 = vrot.slane %v350_v40, 4 }
 0x18c   : > { %v862_v29 = vmax.f32 %v860_v19, %v861_v47  ;;  %v733_v19 = vadd.f32 %v732_v52, %v731_v36 }
 0x18d   : > { %v870_v17 = vmax.f32 %v868_v44, %v869_v18  ;;  %v781_v44 = vadd.f32 %v780_v37, %v779_v20  ;;  %v345_v18 = vadd.f32 %v344_v31, %v343_v24 }
 0x18e   : > { %v863_v16 = vrot.slane %v862_v29, 1  ;;  %v2734_v13 = vsel %vm782_vm0, %v733_v19, %v774_v8 }
 0x18f   : > { %v871_v32 = vrot.slane %v870_v17, 1  ;;  %v2737_v15 = vsel %vm782_vm0, %v740_v58, %v781_v44 }
 0x190   : > { %v864_v3 = vmax.f32 %v862_v29, %v863_v16  ;;  %v346_v16 = vrot.slane %v345_v18, 2 }
 0x191   : > { %v872_v5 = vmax.f32 %v870_v17, %v871_v32  ;;  %v352_v17 = vadd.f32 %v351_v59, %v350_v40  ;;  %v2080_v32 = vmov 0.0  }
 0x192   : > { %vm873_vm7 = vcmp.eq.f32.partialorder %v2681_v7, %v864_v3  ;;  %vm875_vm8 = vcmp.eq.f32.partialorder %v2697_v0, %v864_v3  ;;  %v347_v56 = vadd.f32 %v346_v16, %v345_v18  ;;  %v2791_v18 = vstv %s1609_s25 }
 0x193   : > { %vm874_vm9 = vcmp.eq.f32.partialorder %v2687_v45, %v872_v5  ;;  %vm876_vm10 = vcmp.eq.f32.partialorder %v2703_v23, %v872_v5  ;;  %v877_v2 = vsel %vm873_vm7, %v2711_v35, 10  ;;  %v879_v63 = vsel %vm875_vm8, %v2714_v11, 10 }
 0x194   : > { %v878_v42 = vsel %vm874_vm9, %v2711_v35, 10  ;;  %v880_v10 = vsel %vm876_vm10, %v2714_v11, 10  ;;  %v881_v49 = vsel %vm785_vm1, %v879_v63, 2147483647  ;;  %v353_v21 = vrot.slane %v352_v17, 2 }
 0x195   : > { %vm882_vm11 = vcmp.lt.s32.totalorder %v877_v2, %v881_v49  ;;  %v893_v22 = vsel %vm785_vm1, %v880_v10, 2147483647 }
 0x196   : > { %v883_v1 = vsel %vm882_vm11, %v877_v2, %v881_v49  ;;  %vm894_vm12 = vcmp.lt.s32.totalorder %v878_v42, %v893_v22 }
 0x197   : > { %v884_v48 = vrot.slane %v883_v1, 4  ;;  %v895_v51 = vsel %vm894_vm12, %v878_v42, %v893_v22  ;;  %v354_v22 = vadd.f32 %v353_v21, %v352_v17 }
 0x198   : > { %v896_v61 = vrot.slane %v895_v51, 4 }
 0x199   : > { %vm885_vm13 = vcmp.lt.s32.totalorder %v883_v1, %v884_v48  ;;  %v355_v39 = vrot.slane %v354_v22, 1 }
 0x19a   : > { %v886_v28 = vsel %vm885_vm13, %v883_v1, %v884_v48  ;;  %vm897_vm14 = vcmp.lt.s32.totalorder %v895_v51, %v896_v61 }
 0x19b   : > { %v887_v33 = vrot.slane %v886_v28, 2  ;;  %v898_v9 = vsel %vm897_vm14, %v895_v51, %v896_v61  ;;  %v348_v61 = vrot.slane %v347_v56, 1  ;;  %v2789_v58 = vadd.f32 %v355_v39, %v354_v22 }
 0x19c   : > { %v899_v30 = vrot.slane %v898_v9, 2 }
 0x19d   : > { %vm888_vm15 = vcmp.lt.s32.totalorder %v886_v28, %v887_v33 }
 0x19e   : > { %v889_v47 = vsel %vm888_vm15, %v886_v28, %v887_v33  ;;  %vm900_vm2 = vcmp.lt.s32.totalorder %v898_v9, %v899_v30 }
 0x19f   : > { %v890_v41 = vrot.slane %v889_v47, 1  ;;  %v901_v29 = vsel %vm900_vm2, %v898_v9, %v899_v30  ;;  %v2787_v30 = vadd.f32 %v348_v61, %v347_v56 }
 0x1a0   : > { %v902_v60 = vrot.slane %v901_v29, 1 }
 0x1a1   : > { %vm891_vm3 = vcmp.lt.s32.totalorder %v889_v47, %v890_v41 }
 0x1a2   : > { %v892_v12 = vsel %vm891_vm3, %v889_v47, %v890_v41  ;;  %vm903_vm4 = vcmp.lt.s32.totalorder %v901_v29, %v902_v60 }
 0x1a3   : > { %v904_v54 = vsel %vm903_vm4, %v901_v29, %v902_v60  ;;  %vm905_vm5 = vcmp.eq.s32.totalorder %v2711_v35, %v892_v12  ;;  %vm907_vm6 = vcmp.eq.s32.totalorder %v2714_v11, %v892_v12 }
 0x1a4   : > { %vm906_vm7 = vcmp.eq.s32.totalorder %v2711_v35, %v904_v54  ;;  %vm908_vm8 = vcmp.eq.s32.totalorder %v2714_v11, %v904_v54  ;;  %v2744_v62 = vsel %vm905_vm5, 1.0, %v2080_v32  ;;  %v2749_v14 = vsel %vm907_vm6, 1.0, %v2080_v32 }
 0x1a5   : > { %v2752_v53 = vsel %vm906_vm7, 1.0, %v2080_v32  ;;  %v2755_v3 = vsel %vm908_vm8, 1.0, %v2080_v32  ;;  %v917_v4 = vmul.f32 %v2744_v62, %v2675_v46  ;;  %v919_v43 = vmul.f32 %v2749_v14, %v2734_v13 }
 0x1a6   : > { %v918_v38 = vmul.f32 %v2752_v53, %v2678_v34  ;;  %v920_v25 = vmul.f32 %v2755_v3, %v2737_v15  ;;  %v2766_v5 = vsel %vm905_vm5, -inf, %v2681_v7  ;;  %v2769_v50 = vsel %vm906_vm7, -inf, %v2687_v45 }
 0x1a7   : > { %v921_v57 = vsel %vm785_vm1, %v919_v43, 0.0  ;;  %v2775_v2 = vsel %vm907_vm6, -inf, %v2697_v0  ;;  %v2778_v63 = vsel %vm908_vm8, -inf, %v2703_v23 }
 0x1a8   : > { %v922_v36 = vadd.f32 %v921_v57, %v917_v4  ;;  %v929_v42 = vsel %vm785_vm1, %v920_v25, 0.0  ;;  %v966_v7 = vsel %vm785_vm1, %v2775_v2, -inf  ;;  %v974_v45 = vsel %vm785_vm1, %v2778_v63, -inf }
 0x1a9   : > { %v930_v10 = vadd.f32 %v929_v42, %v918_v38  ;;  %v967_v49 = vmax.f32 %v2766_v5, %v966_v7  ;;  %v975_v55 = vmax.f32 %v2769_v50, %v974_v45 }
 0x1aa   : > { %v923_v0 = vrot.slane %v922_v36, 4 }
 0x1ab   : > { %v931_v20 = vrot.slane %v930_v10, 4  ;;  %v968_v23 = vrot.slane %v967_v49, 4  ;;  %v976_v26 = vrot.slane %v975_v55, 4 }
 0x1ac   : > { %v924_v1 = vadd.f32 %v923_v0, %v922_v36 }
 0x1ad   : > { %v932_v24 = vadd.f32 %v931_v20, %v930_v10  ;;  %v969_v48 = vmax.f32 %v967_v49, %v968_v23  ;;  %v977_v51 = vmax.f32 %v975_v55, %v976_v26 }
 0x1ae   : > { %v925_v52 = vrot.slane %v924_v1, 2 }
 0x1af   : > { %v933_v27 = vrot.slane %v932_v24, 2  ;;  %v970_v37 = vrot.slane %v969_v48, 2  ;;  %v978_v40 = vrot.slane %v977_v51, 2 }
 0x1b0   : > { %v926_v28 = vadd.f32 %v925_v52, %v924_v1 }
 0x1b1   : > { %v934_v31 = vadd.f32 %v933_v27, %v932_v24  ;;  %v971_v33 = vmax.f32 %v969_v48, %v970_v37  ;;  %v979_v9 = vmax.f32 %v977_v51, %v978_v40 }
 0x1b2   : > { %v927_v19 = vrot.slane %v926_v28, 1 }
 0x1b3   : > { %v935_v8 = vrot.slane %v934_v31, 1  ;;  %v972_v44 = vrot.slane %v971_v33, 1  ;;  %v980_v59 = vrot.slane %v979_v9, 1 }
 0x1b4   : > { %v928_v47 = vadd.f32 %v927_v19, %v926_v28 }
 0x1b5   : > { %v936_v41 = vadd.f32 %v935_v8, %v934_v31  ;;  %v973_v29 = vmax.f32 %v971_v33, %v972_v44  ;;  %v981_v60 = vmax.f32 %v979_v9, %v980_v59 }
 0x1b6   : > { %v937_v17 = vadd.f32 %v928_v47, %v2787_v30 }
 0x1b7   : > { %v938_v12 = vadd.f32 %v936_v41, %v2789_v58  ;;  %vm982_vm0 = vcmp.eq.f32.partialorder %v2766_v5, %v973_v29  ;;  %vm983_vm9 = vcmp.eq.f32.partialorder %v2769_v50, %v981_v60  ;;  %vm984_vm10 = vcmp.eq.f32.partialorder %v2775_v2, %v973_v29 }
 0x1b8   : > { %v940_v16 = vadd.f32 %v2791_v18, %v937_v17  ;;  %vm985_vm11 = vcmp.eq.f32.partialorder %v2778_v63, %v981_v60  ;;  %v986_v54 = vsel %vm982_vm0, %v2711_v35, 10  ;;  %v987_v4 = vsel %vm983_vm9, %v2711_v35, 10 }
 0x1b9   : > { %v941_v43 = vadd.f32 %v2791_v18, %v938_v12  ;;  %v988_v38 = vsel %vm984_vm10, %v2714_v11, 10  ;;  %v989_v25 = vsel %vm985_vm11, %v2714_v11, 10 }
 0x1ba   : > { %v1654_v21 = vmul.f32 -1.442695, %v940_v16  ;;  %v990_v57 = vsel %vm785_vm1, %v988_v38, 2147483647  ;;  %v1002_v36 = vsel %vm785_vm1, %v989_v25, 2147483647 }
 0x1bb   : > { %v1655_v42 = vmul.f32 -1.442695, %v941_v43  ;;  %vm991_vm12 = vcmp.lt.s32.totalorder %v986_v54, %v990_v57  ;;  %vm1003_vm13 = vcmp.lt.s32.totalorder %v987_v4, %v1002_v36 }
 0x1bc   : > { %1811 = vpow2.f32 %v1654_v21  ;;  %v992_v7 = vsel %vm991_vm12, %v986_v54, %v990_v57  ;;  %v1004_v45 = vsel %vm1003_vm13, %v987_v4, %v1002_v36 }
 0x1bd   : > { %1813 = vpow2.f32 %v1655_v42  ;;  %v993_v10 = vrot.slane %v992_v7, 4  ;;  %v1005_v49 = vrot.slane %v1004_v45, 4 }
 0x1bf   : > { %vm994_vm14 = vcmp.lt.s32.totalorder %v992_v7, %v993_v10  ;;  %vm1006_vm15 = vcmp.lt.s32.totalorder %v1004_v45, %v1005_v49 }
 0x1c0   : > { %v995_v55 = vsel %vm994_vm14, %v992_v7, %v993_v10  ;;  %v1007_v56 = vsel %vm1006_vm15, %v1004_v45, %v1005_v49 }
 0x1c1   : > { %v996_v0 = vrot.slane %v995_v55, 2  ;;  %v1008_v22 = vrot.slane %v1007_v56, 2 }
 0x1c3   : > { %vm997_vm2 = vcmp.lt.s32.totalorder %v995_v55, %v996_v0  ;;  %vm1009_vm3 = vcmp.lt.s32.totalorder %v1007_v56, %v1008_v22 }
 0x1c4   : > { %v998_v20 = vsel %vm997_vm2, %v995_v55, %v996_v0  ;;  %v1010_v23 = vsel %vm1009_vm3, %v1007_v56, %v1008_v22 }
 0x1c5   : > { %v999_v26 = vrot.slane %v998_v20, 1  ;;  %v1011_v1 = vrot.slane %v1010_v23, 1 }
 0x1c6   : > { %v1812_v24 = vpop.eup %1811 }
 0x1c7   : > { %v1814_v48 = vpop.eup %1813  ;;  %v948_v51 = vadd.f32 1.0, %v1812_v24  ;;  %vm1000_vm4 = vcmp.lt.s32.totalorder %v998_v20, %v999_v26  ;;  %vm1012_vm5 = vcmp.lt.s32.totalorder %v1010_v23, %v1011_v1 }
 0x1c8   : > { %v949_v61 = vadd.f32 1.0, %v1814_v48  ;;  %v1001_v52 = vsel %vm1000_vm4, %v998_v20, %v999_v26  ;;  %v1013_v39 = vsel %vm1012_vm5, %v1010_v23, %v1011_v1 }
 0x1c9   : > { %1815 = vrcp.f32 %v948_v51  ;;  %vm1014_vm6 = vcmp.eq.s32.totalorder %v2711_v35, %v1001_v52  ;;  %vm1015_vm7 = vcmp.eq.s32.totalorder %v2711_v35, %v1013_v39  ;;  %vm1016_vm8 = vcmp.eq.s32.totalorder %v2714_v11, %v1001_v52 }
 0x1ca   : > { %1817 = vrcp.f32 %v949_v61  ;;  %vm1017_vm0 = vcmp.eq.s32.totalorder %v2714_v11, %v1013_v39  ;;  %v2812_v27 = vsel %vm1014_vm6, 1.0, %v2080_v32  ;;  %v2815_v37 = vsel %vm1015_vm7, 1.0, %v2080_v32 }
 0x1cb   : > { %v2818_v40 = vsel %vm1016_vm8, 1.0, %v2080_v32  ;;  %v2821_v28 = vsel %vm1017_vm0, 1.0, %v2080_v32  ;;  %v1026_v31 = vmul.f32 %v2812_v27, %v2675_v46  ;;  %v1027_v33 = vmul.f32 %v2815_v37, %v2678_v34 }
 0x1cc   : > { %v1028_v9 = vmul.f32 %v2818_v40, %v2734_v13  ;;  %v1029_v19 = vmul.f32 %v2821_v28, %v2737_v15  ;;  %v2832_v8 = vsel %vm1014_vm6, -inf, %v2766_v5  ;;  %v2835_v44 = vsel %vm1015_vm7, -inf, %v2769_v50 }
 0x1cd   : > { %v2838_v59 = vsel %vm1016_vm8, -inf, %v2775_v2  ;;  %v2841_v47 = vsel %vm1017_vm0, -inf, %v2778_v63 }
 0x1ce   : > { %v1030_v41 = vsel %vm785_vm1, %v1028_v9, 0.0  ;;  %v1038_v29 = vsel %vm785_vm1, %v1029_v19, 0.0  ;;  %v1074_v60 = vsel %vm785_vm1, %v2838_v59, -inf  ;;  %v1082_v5 = vsel %vm785_vm1, %v2841_v47, -inf }
 0x1cf   : > { %v1031_v17 = vadd.f32 %v1030_v41, %v1026_v31  ;;  %v1039_v12 = vadd.f32 %v1038_v29, %v1027_v33  ;;  %v1075_v50 = vmax.f32 %v2832_v8, %v1074_v60  ;;  %v1083_v2 = vmax.f32 %v2835_v44, %v1082_v5 }
 0x1d1   : > { %v1032_v16 = vrot.slane %v1031_v17, 4  ;;  %v1040_v54 = vrot.slane %v1039_v12, 4  ;;  %v1076_v63 = vrot.slane %v1075_v50, 4  ;;  %v1084_v4 = vrot.slane %v1083_v2, 4 }
 0x1d3   : > { %v1816_v43 = vpop.eup %1815  ;;  %v1033_v38 = vadd.f32 %v1032_v16, %v1031_v17  ;;  %v1041_v25 = vadd.f32 %v1040_v54, %v1039_v12  ;;  %v1077_v21 = vmax.f32 %v1075_v50, %v1076_v63  ;;  %v1085_v57 = vmax.f32 %v1083_v2, %v1084_v4 }
 0x1d4   : > { %v1818_v36 = vpop.eup %1817  ;;  %v2852_v42 = vmul.f32 %v1816_v43, %v2744_v62  ;;  %v2855_v7 = vmul.f32 %v1816_v43, %v2749_v14 }
 0x1d5   : > { %v2858_v45 = vmul.f32 %v1818_v36, %v2752_v53  ;;  %v2861_v10 = vmul.f32 %v1818_v36, %v2755_v3  ;;  %v1034_v49 = vrot.slane %v1033_v38, 2  ;;  %v1042_v55 = vrot.slane %v1041_v25, 2 }
 0x1d6   : > { %v1078_v56 = vrot.slane %v1077_v21, 2  ;;  %v1086_v0 = vrot.slane %v1085_v57, 2 }
 0x1d7   : > { %v1035_v22 = vadd.f32 %v1034_v49, %v1033_v38  ;;  %v1043_v20 = vadd.f32 %v1042_v55, %v1041_v25 }
 0x1d8   : > { %v1079_v23 = vmax.f32 %v1077_v21, %v1078_v56  ;;  %v1087_v26 = vmax.f32 %v1085_v57, %v1086_v0 }
 0x1d9   : > { %v1036_v1 = vrot.slane %v1035_v22, 1  ;;  %v1044_v62 = vrot.slane %v1043_v20, 1 }
 0x1da   : > { %v1080_v24 = vrot.slane %v1079_v23, 1  ;;  %v1088_v48 = vrot.slane %v1087_v26, 1 }
 0x1db   : > { %v1037_v14 = vadd.f32 %v1036_v1, %v1035_v22  ;;  %v1045_v51 = vadd.f32 %v1044_v62, %v1043_v20 }
 0x1dc   : > { %v1081_v61 = vmax.f32 %v1079_v23, %v1080_v24  ;;  %v1089_v53 = vmax.f32 %v1087_v26, %v1088_v48 }
 0x1dd   : > { %v1046_v52 = vadd.f32 %v1037_v14, %v2787_v30  ;;  %v1047_v3 = vadd.f32 %v1045_v51, %v2789_v58 }
 0x1de   : > { %vm1090_vm9 = vcmp.eq.f32.partialorder %v2832_v8, %v1081_v61  ;;  %vm1091_vm10 = vcmp.eq.f32.partialorder %v2835_v44, %v1089_v53  ;;  %vm1092_vm11 = vcmp.eq.f32.partialorder %v2838_v59, %v1081_v61  ;;  %vm1093_vm12 = vcmp.eq.f32.partialorder %v2841_v47, %v1089_v53 }
 0x1df   : > { %v1048_v39 = vadd.f32 %v1046_v52, %v2791_v18  ;;  %v1049_v31 = vadd.f32 %v1047_v3, %v2791_v18  ;;  %v1094_v33 = vsel %vm1090_vm9, %v2711_v35, 10  ;;  %v1095_v9 = vsel %vm1091_vm10, %v2711_v35, 10 }
 0x1e0   : > { %v1096_v19 = vsel %vm1092_vm11, %v2714_v11, 10  ;;  %v1097_v41 = vsel %vm1093_vm12, %v2714_v11, 10 }
 0x1e1   : > { %v1660_v29 = vmul.f32 -1.442695, %v1048_v39  ;;  %v1661_v60 = vmul.f32 -1.442695, %v1049_v31  ;;  %v1098_v5 = vsel %vm785_vm1, %v1096_v19, 2147483647 }
 0x1e2   : > { %vm1099_vm13 = vcmp.lt.s32.totalorder %v1094_v33, %v1098_v5  ;;  %v1110_v17 = vsel %vm785_vm1, %v1097_v41, 2147483647 }
 0x1e3   : > { %1819 = vpow2.f32 %v1660_v29  ;;  %v1100_v12 = vsel %vm1099_vm13, %v1094_v33, %v1098_v5  ;;  %vm1111_vm14 = vcmp.lt.s32.totalorder %v1095_v9, %v1110_v17 }
 0x1e4   : > { %1821 = vpow2.f32 %v1661_v60  ;;  %v1101_v50 = vrot.slane %v1100_v12, 4  ;;  %v1112_v2 = vsel %vm1111_vm14, %v1095_v9, %v1110_v17 }
 0x1e5   : > { %v1113_v16 = vrot.slane %v1112_v2, 4 }
 0x1e6   : > { %vm1102_vm15 = vcmp.lt.s32.totalorder %v1100_v12, %v1101_v50 }
 0x1e7   : > { %v1103_v54 = vsel %vm1102_vm15, %v1100_v12, %v1101_v50  ;;  %vm1114_vm2 = vcmp.lt.s32.totalorder %v1112_v2, %v1113_v16 }
 0x1e8   : > { %v1104_v63 = vrot.slane %v1103_v54, 2  ;;  %v1115_v4 = vsel %vm1114_vm2, %v1112_v2, %v1113_v16 }
 0x1e9   : > { %v1116_v43 = vrot.slane %v1115_v4, 2 }
 0x1ea   : > { %vm1105_vm3 = vcmp.lt.s32.totalorder %v1103_v54, %v1104_v63 }
 0x1eb   : > { %v1106_v38 = vsel %vm1105_vm3, %v1103_v54, %v1104_v63  ;;  %vm1117_vm4 = vcmp.lt.s32.totalorder %v1115_v4, %v1116_v43 }
 0x1ec   : > { %v1107_v25 = vrot.slane %v1106_v38, 1  ;;  %v1118_v21 = vsel %vm1117_vm4, %v1115_v4, %v1116_v43 }
 0x1ed   : > { %v1820_v57 = vpop.eup %1819  ;;  %v1119_v36 = vrot.slane %v1118_v21, 1 }
 0x1ee   : > { %v1822_v49 = vpop.eup %1821  ;;  %v1056_v55 = vadd.f32 1.0, %v1820_v57  ;;  %vm1108_vm5 = vcmp.lt.s32.totalorder %v1106_v38, %v1107_v25 }
 0x1ef   : > { %v1057_v56 = vadd.f32 1.0, %v1822_v49  ;;  %v1109_v0 = vsel %vm1108_vm5, %v1106_v38, %v1107_v25  ;;  %vm1120_vm6 = vcmp.lt.s32.totalorder %v1118_v21, %v1119_v36 }
 0x1f0   : > { %1823 = vrcp.f32 %v1056_v55  ;;  %v1121_v22 = vsel %vm1120_vm6, %v1118_v21, %v1119_v36  ;;  %vm1122_vm7 = vcmp.eq.s32.totalorder %v2711_v35, %v1109_v0  ;;  %vm1124_vm8 = vcmp.eq.s32.totalorder %v2714_v11, %v1109_v0 }
 0x1f1   : > { %1825 = vrcp.f32 %v1057_v56  ;;  %vm1123_vm0 = vcmp.eq.s32.totalorder %v2711_v35, %v1121_v22  ;;  %vm1125_vm9 = vcmp.eq.s32.totalorder %v2714_v11, %v1121_v22  ;;  %v2882_v20 = vsel %vm1122_vm7, 1.0, %v2080_v32 }
 0x1f2   : > { %v2885_v23 = vsel %vm1123_vm0, 1.0, %v2080_v32  ;;  %v2888_v26 = vsel %vm1124_vm8, 1.0, %v2080_v32  ;;  %v2891_v1 = vsel %vm1125_vm9, 1.0, %v2080_v32  ;;  %v1134_v62 = vmul.f32 %v2882_v20, %v2675_v46 }
 0x1f3   : > { %v1135_v24 = vmul.f32 %v2885_v23, %v2678_v34  ;;  %v1136_v48 = vmul.f32 %v2888_v26, %v2734_v13  ;;  %v1137_v14 = vmul.f32 %v2891_v1, %v2737_v15  ;;  %v1178_v51 = vsel %vm1122_vm7, -inf, %v2832_v8 }
 0x1f4   : > { %v1179_v61 = vsel %vm1123_vm0, -inf, %v2835_v44  ;;  %v1180_v53 = vsel %vm1124_vm8, -inf, %v2838_v59  ;;  %v1181_v52 = vsel %vm1125_vm9, -inf, %v2841_v47 }
 0x1f5   : > { %v1138_v3 = vsel %vm785_vm1, %v1136_v48, 0.0  ;;  %v1146_v39 = vsel %vm785_vm1, %v1137_v14, 0.0  ;;  %v1182_v31 = vsel %vm785_vm1, %v1180_v53, -inf  ;;  %v1190_v33 = vsel %vm785_vm1, %v1181_v52, -inf }
 0x1f6   : > { %v1139_v9 = vadd.f32 %v1138_v3, %v1134_v62  ;;  %v1147_v19 = vadd.f32 %v1146_v39, %v1135_v24  ;;  %v1183_v41 = vmax.f32 %v1178_v51, %v1182_v31  ;;  %v1191_v29 = vmax.f32 %v1179_v61, %v1190_v33 }
 0x1f8   : > { %v1140_v60 = vrot.slane %v1139_v9, 4  ;;  %v1148_v8 = vrot.slane %v1147_v19, 4  ;;  %v1184_v5 = vrot.slane %v1183_v41, 4  ;;  %v1192_v44 = vrot.slane %v1191_v29, 4 }
 0x1fa   : > { %v1824_v17 = vpop.eup %1823  ;;  %v1141_v59 = vadd.f32 %v1140_v60, %v1139_v9  ;;  %v1149_v12 = vadd.f32 %v1148_v8, %v1147_v19  ;;  %v1185_v47 = vmax.f32 %v1183_v41, %v1184_v5  ;;  %v1193_v50 = vmax.f32 %v1191_v29, %v1192_v44 }
 0x1fb   : > { %v1826_v2 = vpop.eup %1825  ;;  %v1062_v16 = vmul.f32 %v1824_v17, %v2812_v27  ;;  %v1064_v54 = vmul.f32 %v1824_v17, %v2818_v40 }
 0x1fc   : > { %v1063_v63 = vmul.f32 %v1826_v2, %v2815_v37  ;;  %v1065_v4 = vmul.f32 %v1826_v2, %v2821_v28  ;;  %v1142_v43 = vrot.slane %v1141_v59, 2  ;;  %v1150_v38 = vrot.slane %v1149_v12, 2 }
 0x1fd   : > { %v2914_v25 = vadd.f32 %v1062_v16, %v2852_v42  ;;  %v2917_v21 = vadd.f32 %v1064_v54, %v2855_v7  ;;  %v1186_v57 = vrot.slane %v1185_v47, 2  ;;  %v1194_v36 = vrot.slane %v1193_v50, 2 }
 0x1fe   : > { %v2920_v49 = vadd.f32 %v1063_v63, %v2858_v45  ;;  %v2923_v27 = vadd.f32 %v1065_v4, %v2861_v10  ;;  %v1143_v40 = vadd.f32 %v1142_v43, %v1141_v59  ;;  %v1151_v37 = vadd.f32 %v1150_v38, %v1149_v12 }
 0x1ff   : > { %v1187_v55 = vmax.f32 %v1185_v47, %v1186_v57  ;;  %v1195_v28 = vmax.f32 %v1193_v50, %v1194_v36 }
 0x200   : > { %v1144_v56 = vrot.slane %v1143_v40, 1  ;;  %v1152_v0 = vrot.slane %v1151_v37, 1 }
 0x201   : > { %v1188_v22 = vrot.slane %v1187_v55, 1  ;;  %v1196_v42 = vrot.slane %v1195_v28, 1 }
 0x202   : > { %v1145_v62 = vadd.f32 %v1144_v56, %v1143_v40  ;;  %v1153_v24 = vadd.f32 %v1152_v0, %v1151_v37 }
 0x203   : > { %v1189_v7 = vmax.f32 %v1187_v55, %v1188_v22  ;;  %v1197_v48 = vmax.f32 %v1195_v28, %v1196_v42 }
 0x204   : > { %v1154_v14 = vadd.f32 %v1145_v62, %v2787_v30  ;;  %v1155_v45 = vadd.f32 %v1153_v24, %v2789_v58 }
 0x205   : > { %vm1198_vm10 = vcmp.eq.f32.partialorder %v1178_v51, %v1189_v7  ;;  %vm1199_vm11 = vcmp.eq.f32.partialorder %v1179_v61, %v1197_v48  ;;  %vm1200_vm12 = vcmp.eq.f32.partialorder %v1180_v53, %v1189_v7  ;;  %vm1201_vm13 = vcmp.eq.f32.partialorder %v1181_v52, %v1197_v48 }
 0x206   : > { %v1156_v10 = vadd.f32 %v1154_v14, %v2791_v18  ;;  %v1157_v3 = vadd.f32 %v1155_v45, %v2791_v18  ;;  %v1202_v39 = vsel %vm1198_vm10, %v2711_v35, 10  ;;  %v1203_v31 = vsel %vm1199_vm11, %v2711_v35, 10 }
 0x207   : > { %v1204_v33 = vsel %vm1200_vm12, %v2714_v11, 10  ;;  %v1205_v9 = vsel %vm1201_vm13, %v2714_v11, 10 }
 0x208   : > { %v1666_v19 = vmul.f32 -1.442695, %v1156_v10  ;;  %v1667_v41 = vmul.f32 -1.442695, %v1157_v3  ;;  %v1206_v29 = vsel %vm785_vm1, %v1204_v33, 2147483647 }
 0x209   : > { %vm1207_vm14 = vcmp.lt.s32.totalorder %v1202_v39, %v1206_v29  ;;  %v1218_v51 = vsel %vm785_vm1, %v1205_v9, 2147483647 }
 0x20a   : > { %1827 = vpow2.f32 %v1666_v19  ;;  %v1208_v61 = vsel %vm1207_vm14, %v1202_v39, %v1206_v29  ;;  %vm1219_vm15 = vcmp.lt.s32.totalorder %v1203_v31, %v1218_v51 }
 0x20b   : > { %1829 = vpow2.f32 %v1667_v41  ;;  %v1209_v53 = vrot.slane %v1208_v61, 4  ;;  %v1220_v52 = vsel %vm1219_vm15, %v1203_v31, %v1218_v51 }
 0x20c   : > { %v1221_v60 = vrot.slane %v1220_v52, 4 }
 0x20d   : > { %vm1210_vm2 = vcmp.lt.s32.totalorder %v1208_v61, %v1209_v53 }
 0x20e   : > { %v1211_v8 = vsel %vm1210_vm2, %v1208_v61, %v1209_v53  ;;  %vm1222_vm3 = vcmp.lt.s32.totalorder %v1220_v52, %v1221_v60 }
 0x20f   : > { %v1212_v5 = vrot.slane %v1211_v8, 2  ;;  %v1223_v44 = vsel %vm1222_vm3, %v1220_v52, %v1221_v60 }
 0x210   : > { %v1224_v17 = vrot.slane %v1223_v44, 2 }
 0x211   : > { %vm1213_vm4 = vcmp.lt.s32.totalorder %v1211_v8, %v1212_v5 }
 0x212   : > { %v1214_v59 = vsel %vm1213_vm4, %v1211_v8, %v1212_v5  ;;  %vm1225_vm5 = vcmp.lt.s32.totalorder %v1223_v44, %v1224_v17  ;;  %v2962_v8 = vsub.s32 0, %v2711_v35 }
 0x213   : > { %v1215_v12 = vrot.slane %v1214_v59, 1  ;;  %v1226_v47 = vsel %vm1225_vm5, %v1223_v44, %v1224_v17  ;;  %v1320_v44 = vsub.s32 2, %v2711_v35  ;;  %v1336_v17 = vsub.s32 3, %v2711_v35 }
 0x214   : > { %v1828_v50 = vpop.eup %1827  ;;  %v1227_v2 = vrot.slane %v1226_v47, 1 }
 0x215   : > { %v1830_v16 = vpop.eup %1829  ;;  %v1164_v54 = vadd.f32 1.0, %v1828_v50  ;;  %vm1216_vm6 = vcmp.lt.s32.totalorder %v1214_v59, %v1215_v12 }
 0x216   : > { %v1165_v63 = vadd.f32 1.0, %v1830_v16  ;;  %v1217_v4 = vsel %vm1216_vm6, %v1214_v59, %v1215_v12  ;;  %vm1228_vm7 = vcmp.lt.s32.totalorder %v1226_v47, %v1227_v2  ;;  %v1368_v16 = vsub.s32 5, %v2711_v35 }
 0x217   : > { %1831 = vrcp.f32 %v1164_v54  ;;  %v1229_v43 = vsel %vm1228_vm7, %v1226_v47, %v1227_v2  ;;  %vm1230_vm8 = vcmp.eq.s32.totalorder %v2711_v35, %v1217_v4  ;;  %vm1232_vm0 = vcmp.eq.s32.totalorder %v2714_v11, %v1217_v4 }
 0x218   : > { %1833 = vrcp.f32 %v1165_v63  ;;  %vm1231_vm9 = vcmp.eq.s32.totalorder %v2711_v35, %v1229_v43  ;;  %vm1233_vm10 = vcmp.eq.s32.totalorder %v2714_v11, %v1229_v43  ;;  %v1668_v38 = vsel %vm1230_vm8, 1.0, %v2080_v32 }
 0x219   : > { %v1669_v57 = vsel %vm1231_vm9, 1.0, %v2080_v32  ;;  %v1670_v36 = vsel %vm1232_vm0, 1.0, %v2080_v32  ;;  %v1671_v40 = vsel %vm1233_vm10, 1.0, %v2080_v32  ;;  %v1242_v37 = vmul.f32 %v1668_v38, %v2675_v46 }
 0x21a   : > { %v1243_v55 = vmul.f32 %v1669_v57, %v2678_v34  ;;  %v1244_v28 = vmul.f32 %v1670_v36, %v2734_v13  ;;  %v1245_v56 = vmul.f32 %v1671_v40, %v2737_v15  ;;  %v1352_v2 = vsub.s32 4, %v2711_v35 }
 0x21b   : > { %v1384_v4 = vsub.s32 6, %v2711_v35  ;;  %v1400_v43 = vsub.s32 7, %v2711_v35 }
 0x21c   : > { %v1246_v0 = vsel %vm785_vm1, %v1244_v28, 0.0  ;;  %v1254_v11 = vsel %vm785_vm1, %v1245_v56, 0.0 }
 0x21d   : > { %v1247_v22 = vadd.f32 %v1246_v0, %v1242_v37  ;;  %v1255_v42 = vadd.f32 %v1254_v11, %v1243_v55  ;;  %v1844_v0 = vld [vmem:[%s2313_s12] sm:$0xff] }
 0x21f   : > { %v1248_v62 = vrot.slane %v1247_v22, 4  ;;  %v1256_v24 = vrot.slane %v1255_v42, 4 }
 0x221   : > { %v1832_v7 = vpop.eup %1831  ;;  %v1249_v48 = vadd.f32 %v1248_v62, %v1247_v22  ;;  %v1257_v14 = vadd.f32 %v1256_v24, %v1255_v42  ;;  %v1845_v22 = vld [vmem:[%s2313_s12 + $0x10] sm:$0xff]  ;;  %v1846_v62 = vld [vmem:[%s2313_s12 + $0x20] sm:$0xff] }
 0x222   : > { %v1834_v32 = vpop.eup %1833  ;;  %v1170_v46 = vmul.f32 %v1832_v7, %v2882_v20  ;;  %v1172_v34 = vmul.f32 %v1832_v7, %v2888_v26  ;;  %v1847_v7 = vld [vmem:[%s2313_s12 + $0x30] sm:$0xff] }
 0x223   : > { %v1171_v13 = vmul.f32 %v1834_v32, %v2885_v23  ;;  %v1173_v15 = vmul.f32 %v1834_v32, %v2891_v1  ;;  %v1250_v45 = vrot.slane %v1249_v48, 2  ;;  %v1258_v10 = vrot.slane %v1257_v14, 2 }
 0x224   : > { %v1174_v3 = vadd.f32 %v1170_v46, %v2914_v25  ;;  %v1176_v39 = vadd.f32 %v1172_v34, %v2917_v21  ;;  %v1849_v46 = vld [vmem:[%s2313_s12 + $0x18] sm:$0xff] }
 0x225   : > { %v1175_v31 = vadd.f32 %v1171_v13, %v2920_v49  ;;  %v1177_v33 = vadd.f32 %v1173_v15, %v2923_v27  ;;  %v1251_v9 = vadd.f32 %v1250_v45, %v1249_v48  ;;  %v1259_v19 = vadd.f32 %v1258_v10, %v1257_v14  ;;  %v1848_v14 = vld [vmem:[%s2313_s12 + $0x8] sm:$0xff]  ;;  %v1851_v45 = vld [vmem:[%s2313_s12 + $0x38] sm:$0xff] }
 0x226   : > { %v1850_v13 = vld [vmem:[%s2313_s12 + $0x28] sm:$0xff] }
 0x227   : > { %v1252_v41 = vrot.slane %v1251_v9, 1  ;;  %v1260_v20 = vrot.slane %v1259_v19, 1 }
 0x229   : > { %v1253_v29 = vadd.f32 %v1252_v41, %v1251_v9  ;;  %v1261_v26 = vadd.f32 %v1260_v20, %v1259_v19  ;;  %v1854_v9 = vld [vmem:[%s2313_s12 + $0x40] sm:$0xff]  ;;  %v1855_v41 = vld [vmem:[%s2313_s12 + $0x48] sm:$0xff] }
 0x22b   : > { %v1262_v23 = vadd.f32 %v1253_v29, %v2787_v30  ;;  %v1263_v1 = vadd.f32 %v1261_v26, %v2789_v58  ;;  %v2965_v30 = vsub.s32 1, %v2711_v35  ;;  %v1856_v29 = vld [vmem:[%s2305_s14 + $0x8] sm:$0xff] }
 0x22d   : > { %v1264_v51 = vadd.f32 %v1262_v23, %v2791_v18  ;;  %v1265_v25 = vadd.f32 %v1263_v1, %v2791_v18  ;;  %v1857_v1 = vld [vmem:[%s2313_s12 + $0x50] sm:$0xff] }
 0x22f   : > { %v1672_v61 = vmul.f32 -1.442695, %v1264_v51  ;;  %v1673_v21 = vmul.f32 -1.442695, %v1265_v25  ;;  %v1858_v25 = vld [vmem:[%s2313_s12 + $0x58] sm:$0xff] }
 0x231   : > { %1835 = vpow2.f32 %v1672_v61 }
 0x232   : > { %1837 = vpow2.f32 %v1673_v21 }
 0x23b   : > { %v1836_v49 = vpop.eup %1835 }
 0x23c   : > { %v1838_v27 = vpop.eup %1837  ;;  %v1272_v53 = vadd.f32 1.0, %v1836_v49 }
 0x23d   : > { %v1273_v52 = vadd.f32 1.0, %v1838_v27  ;;  %v1859_v27 = vld [vmem:[%s2313_s12 + $0x60] sm:$0xff] }
 0x23e   : > { %1839 = vrcp.f32 %v1272_v53 }
 0x23f   : > { %1841 = vrcp.f32 %v1273_v52  ;;  %v1860_v52 = vld [vmem:[%s2313_s12 + $0x68] sm:$0xff] }
 0x248   : > { %v1840_v60 = vpop.eup %1839 }
 0x249   : > { %v1842_v58 = vpop.eup %1841  ;;  %v1278_v5 = vmul.f32 %v1840_v60, %v1668_v38  ;;  %v1280_v18 = vmul.f32 %v1840_v60, %v1670_v36 }
 0x24a   : > { %v1279_v59 = vmul.f32 %v1842_v58, %v1669_v57  ;;  %v1281_v12 = vmul.f32 %v1842_v58, %v1671_v40 }
 0x24b   : > { %v2969_v47 = vadd.f32 %v1278_v5, %v1174_v3  ;;  %v2971_v50 = vadd.f32 %v1280_v18, %v1176_v39  ;;  %v1852_v3 = vld [vmem:[%s2305_s14] sm:$0xff]  ;;  %v1861_v18 = vld [vmem:[%s2313_s12 + $0x70] sm:$0xff] }
 0x24c   : > { %v2975_v54 = vadd.f32 %v1279_v59, %v1175_v31  ;;  %v2977_v63 = vadd.f32 %v1281_v12, %v1177_v33  ;;  %v1853_v31 = vld [vmem:[%s2305_s14 + $0x10] sm:$0xff]  ;;  %s1966_s14 = sshll.u32 %s2081_s8, 4  ;;  %s1967_s14 = int_to_ptr.vmem [resolvable:$false] %s1966_s14 }
 0x24d   : > { %v1289_v38 = vrot.slane %v2969_v47, %v2962_v8  ;;  %v1305_v57 = vrot.slane %v2969_v47, %v2965_v30  ;;  %v1321_v36 = vrot.slane %v2969_v47, %v1320_v44  ;;  %v1337_v40 = vrot.slane %v2969_v47, %v1336_v17  ;;  %s1968_s4 = scalar_lea.vmem %s1967_s14, 1024  ;;  %p1969_p2 = scmp.lt.s32.totalorder %s3075_s24, %s1967_s14 }
 0x24e   : > { %v1293_v37 = vrot.slane %v2975_v54, %v2962_v8  ;;  %v1309_v55 = vrot.slane %v2975_v54, %v2965_v30  ;;  %v1325_v28 = vrot.slane %v2975_v54, %v1320_v44  ;;  %v1341_v56 = vrot.slane %v2975_v54, %v1336_v17  ;;  %v1862_v17 = vld [vmem:[%s2313_s12 + $0x78] sm:$0xff]  ;;  %p1970_p4 = scmp.lt.s32.totalorder %s1968_s4, %s1962_s22 }
 0x24f   : > { %v1294_v11 = vmul.f32 %v1844_v0, %v1289_v38  ;;  %v1296_v42 = vmul.f32 %v1845_v22, %v1289_v38  ;;  %v1310_v24 = vmul.f32 %v1846_v62, %v1305_v57  ;;  %v1312_v48 = vmul.f32 %v1847_v7, %v1305_v57  ;;  %v1863_v0 = vld [vmem:[%s2313_s12 + $0x80] sm:$0xff]  ;;  %v1864_v22 = vld [vmem:[%s2313_s12 + $0x88] sm:$0xff] }
 0x250   : > { %v1295_v32 = vmul.f32 %v1848_v14, %v1293_v37  ;;  %v1297_v34 = vmul.f32 %v1849_v46, %v1293_v37  ;;  %v1311_v15 = vmul.f32 %v1850_v13, %v1309_v55  ;;  %v1313_v10 = vmul.f32 %v1851_v45, %v1309_v55  ;;  %v1867_v46 = vld [vmem:[%s2313_s12 + $0xa0] sm:$0xff]  ;;  %v1868_v13 = vld [vmem:[%s2313_s12 + $0xa8] sm:$0xff]  ;;  %p1971_p6 = por %p1970_p4, %p1969_p2 }
 0x251   : > { %v1298_v39 = vadd.f32 %v1852_v3, %v1294_v11  ;;  %v1300_v33 = vadd.f32 %v1853_v31, %v1296_v42  ;;  %v1326_v19 = vmul.f32 %v1854_v9, %v1321_v36  ;;  %v1327_v20 = vmul.f32 %v1855_v41, %v1325_v28  ;;  %v1870_v31 = vld [vmem:[%s2313_s12 + $0xb8] sm:$0xff] }
 0x252   : > { %v1299_v26 = vadd.f32 %v1856_v29, %v1295_v32  ;;  %v1301_v23 = vadd.f32 %v2730_v6, %v1297_v34  ;;  %v1328_v51 = vmul.f32 %v1857_v1, %v1321_v36  ;;  %v1329_v61 = vmul.f32 %v1858_v25, %v1325_v28  ;;  %p1972_p0 = pnand %p1971_p6, %p1965_p13 }
 0x253   : > { %v1314_v21 = vadd.f32 %v1310_v24, %v1298_v39  ;;  %v1316_v49 = vadd.f32 %v1312_v48, %v1300_v33  ;;  %v1342_v53 = vmul.f32 %v1859_v27, %v1337_v40  ;;  %v1343_v60 = vmul.f32 %v1860_v52, %v1341_v56  ;;  %v1865_v24 = vld [vmem:[%s2313_s12 + $0x90] sm:$0xff]  ;;  %v1866_v48 = vld [vmem:[%s2313_s12 + $0x98] sm:$0xff] }
 0x254   : > { %v1315_v58 = vadd.f32 %v1311_v15, %v1299_v26  ;;  %v1317_v5 = vadd.f32 %v1313_v10, %v1301_v23  ;;  %v1344_v44 = vmul.f32 %v1861_v18, %v1337_v40  ;;  %v1345_v59 = vmul.f32 %v1862_v17, %v1341_v56  ;;  %v1869_v15 = vld [vmem:[%s2313_s12 + $0xb0] sm:$0xff]  ;;  %v1874_v27 = vld [vmem:[%s2313_s12 + $0xd8] sm:$0xff] }
 0x255   : > { %v1330_v12 = vadd.f32 %v1326_v19, %v1314_v21  ;;  %v1332_v6 = vadd.f32 %v1328_v51, %v1316_v49  ;;  %v1353_v38 = vrot.slane %v2969_v47, %v1352_v2  ;;  %v1357_v57 = vrot.slane %v2975_v54, %v1352_v2  ;;  %v1871_v51 = vld [vmem:[%s2313_s12 + $0xc0] sm:$0xff]  ;;  %v1873_v21 = vld [vmem:[%s2313_s12 + $0xd0] sm:$0xff]  ;;  %v1878_v18 = vld [vmem:[%s2313_s12 + $0xf8] sm:$0xff] }
 0x256   : > { %v1331_v36 = vadd.f32 %v1327_v20, %v1315_v58  ;;  %v1333_v37 = vadd.f32 %v1329_v61, %v1317_v5  ;;  %v1369_v55 = vrot.slane %v2969_v47, %v1368_v16  ;;  %v1373_v40 = vrot.slane %v2975_v54, %v1368_v16  ;;  %v1877_v5 = vld [vmem:[%s2313_s12 + $0xf0] sm:$0xff] }
 0x257   : > { %v1346_v28 = vadd.f32 %v1342_v53, %v1330_v12  ;;  %v1348_v56 = vadd.f32 %v1344_v44, %v1332_v6  ;;  %v1358_v11 = vmul.f32 %v1863_v0, %v1353_v38  ;;  %v1359_v42 = vmul.f32 %v1864_v22, %v1357_v57  ;;  %v1875_v53 = vld [vmem:[%s2313_s12 + $0xe0] sm:$0xff]  ;;  %v1881_v0 = vld [vmem:[%s2313_s12 + $0x110] sm:$0xff] }
 0x258   : > { %v1347_v2 = vadd.f32 %v1343_v60, %v1331_v36  ;;  %v1349_v62 = vadd.f32 %v1345_v59, %v1333_v37  ;;  %v1360_v7 = vmul.f32 %v1865_v24, %v1353_v38  ;;  %v1361_v14 = vmul.f32 %v1866_v48, %v1357_v57  ;;  %v1876_v60 = vld [vmem:[%s2313_s12 + $0xe8] sm:$0xff]  ;;  %v1883_v22 = vld [vmem:[%s2313_s12 + $0x120] sm:$0xff]  ;;  %v1885_v24 = vld [vmem:[%s2313_s12 + $0x130] sm:$0xff] }
 0x259   : > { %v1362_v32 = vadd.f32 %v1358_v11, %v1346_v28  ;;  %v1374_v34 = vmul.f32 %v1867_v46, %v1369_v55  ;;  %v1375_v16 = vmul.f32 %v1868_v13, %v1373_v40  ;;  %v1376_v45 = vmul.f32 %v1869_v15, %v1369_v55  ;;  %v1886_v48 = vld [vmem:[%s2313_s12 + $0x138] sm:$0xff] }
 0x25a   : > { %v1363_v10 = vadd.f32 %v1359_v42, %v1347_v2  ;;  %v1364_v3 = vadd.f32 %v1360_v7, %v1348_v56  ;;  %v1365_v39 = vadd.f32 %v1361_v14, %v1349_v62  ;;  %v1377_v33 = vmul.f32 %v1870_v31, %v1373_v40  ;;  %v1884_v2 = vld [vmem:[%s2313_s12 + $0x128] sm:$0xff] }
 0x25b   : > { %v1378_v9 = vadd.f32 %v1374_v34, %v1362_v32  ;;  %v1385_v19 = vrot.slane %v2969_v47, %v1384_v4  ;;  %v1389_v41 = vrot.slane %v2975_v54, %v1384_v4  ;;  %v1401_v20 = vrot.slane %v2969_v47, %v1400_v43  ;;  %v1872_v4 = vld [vmem:[%s2313_s12 + $0xc8] sm:$0xff] }
 0x25c   : > { %v1379_v29 = vadd.f32 %v1375_v16, %v1363_v10  ;;  %v1380_v26 = vadd.f32 %v1376_v45, %v1364_v3  ;;  %v1381_v23 = vadd.f32 %v1377_v33, %v1365_v39  ;;  %v1405_v1 = vrot.slane %v2975_v54, %v1400_v43 }
 0x25d   : > { %v1390_v25 = vmul.f32 %v1871_v51, %v1385_v19  ;;  %v1391_v61 = vmul.f32 %v1872_v4, %v1389_v41  ;;  %v1392_v49 = vmul.f32 %v1873_v21, %v1385_v19  ;;  %v1393_v47 = vmul.f32 %v1874_v27, %v1389_v41 }
 0x25e   : > { %v1406_v52 = vmul.f32 %v1875_v53, %v1401_v20  ;;  %v1407_v58 = vmul.f32 %v1876_v60, %v1405_v1  ;;  %v1408_v35 = vmul.f32 %v1877_v5, %v1401_v20  ;;  %v1409_v54 = vmul.f32 %v1878_v18, %v1405_v1 }
 0x25f   : > { %v1394_v43 = vadd.f32 %v1390_v25, %v1378_v9  ;;  %v1395_v44 = vadd.f32 %v1391_v61, %v1379_v29  ;;  %v1396_v17 = vadd.f32 %v1392_v49, %v1380_v26  ;;  %v1397_v59 = vadd.f32 %v1393_v47, %v1381_v23 }
 0x260   : > { %v1417_v12 = vrot.slane %v2971_v50, %v2962_v8  ;;  %v1421_v6 = vrot.slane %v2977_v63, %v2962_v8  ;;  %v1433_v38 = vrot.slane %v2971_v50, %v2965_v30  ;;  %v1437_v57 = vrot.slane %v2977_v63, %v2965_v30  ;;  %v1879_v8 = vld [vmem:[%s2313_s12 + $0x100] sm:$0xff]  ;;  %v1880_v50 = vld [vmem:[%s2313_s12 + $0x108] sm:$0xff]  ;;  %v1882_v30 = vld [vmem:[%s2313_s12 + $0x118] sm:$0xff] }
 0x261   : > { %v1410_v36 = vadd.f32 %v1406_v52, %v1394_v43  ;;  %v1411_v37 = vadd.f32 %v1407_v58, %v1395_v44  ;;  %v1412_v55 = vadd.f32 %v1408_v35, %v1396_v17  ;;  %v1413_v40 = vadd.f32 %v1409_v54, %v1397_v59 }
 0x262   : > { %v1422_v28 = vmul.f32 %v1879_v8, %v1417_v12  ;;  %v1423_v56 = vmul.f32 %v1880_v50, %v1421_v6  ;;  %v1424_v11 = vmul.f32 %v1881_v0, %v1417_v12  ;;  %v1425_v63 = vmul.f32 %v1882_v30, %v1421_v6 }
 0x263   : > { %v1438_v42 = vmul.f32 %v1883_v22, %v1433_v38  ;;  %v1439_v62 = vmul.f32 %v1884_v2, %v1437_v57  ;;  %v1440_v7 = vmul.f32 %v1885_v24, %v1433_v38  ;;  %v1441_v14 = vmul.f32 %v1886_v48, %v1437_v57 }
 0x264   : > { %v1426_v32 = vadd.f32 %v1422_v28, %v1410_v36  ;;  %v1427_v46 = vadd.f32 %v1423_v56, %v1411_v37  ;;  %v1428_v34 = vadd.f32 %v1424_v11, %v1412_v55  ;;  %v1429_v13 = vadd.f32 %v1425_v63, %v1413_v40 }
 0x266   : > { %v1442_v16 = vadd.f32 %v1438_v42, %v1426_v32  ;;  %v1443_v15 = vadd.f32 %v1439_v62, %v1427_v46  ;;  %v1444_v45 = vadd.f32 %v1440_v7, %v1428_v34  ;;  %v1445_v10 = vadd.f32 %v1441_v14, %v1429_v13 }
 0x268   : > { %1446 = vst [vmem:[%s3063_s19] sm:$0xff] %v1442_v16  ;;  %1447 = vst [vmem:[%s3063_s19 + $0x8] sm:$0xff] %v1443_v15 }
 0x269   : > { %1448 = vst [vmem:[%s3063_s19 + $0x10] sm:$0xff] %v1444_v45  ;;  %1449 = vst [vmem:[%s3063_s19 + $0x18] sm:$0xff] %v1445_v10 }
 0x26a   : > { %1975 = shalt.err (!%p1972_p0)
}
 0x26b   : > { %s1976_s7 = scalar_lea.hbm %s3080_s9, 512  ;;  %s1980_s30 = scalar_lea.hbm %s3214_s3, 2048 }
 0x26c   : > { %p1977_p10 = scmp.ne.s32.totalorder %s3080_s9, %s1976_s7  ;;  %p1981_p8 = scmp.lt.u32.totalorder %s3080_s9, %s3214_s3 }
 0x26d   : > { %p1982_p12 = scmp.lt.u32.totalorder %s1980_s30, %s1976_s7  ;;  %p1984_p3 = scmp.lt.u32.totalorder %s1976_s7, %s3080_s9 }
 0x26e   : > { %p1978_p5 = pnand %p1977_p10, %p3215_p1 }
 0x26f   : > { %p1983_p11 = por %p1982_p12, %p1981_p8 }
 0x270   : > { %p1979_p7 = pneg %p1978_p5 }
 0x271   : > { %p1985_p9 = por %p1984_p3, %p1983_p11 }
 0x273   : > { %p1986_p13 = pnand %p1985_p9, %p1979_p7 }
 0x275   : > { %1989 = shalt.err (!%p1986_p13)
}
 0x276   : > { %s2082_s26 = smov 256   ;;  %s2083_s25 = smov 512  }
 0x277   : > { %s2084_s5 = smov 16  }
 0x278   : > { %1691 = dma.vmem_to_hbm [thread:$0]  (%p3215_p1), %s3075_s24, 512, %s3080_s9, %s1451_s6, %s2082_s26, %s2083_s25, %s2084_s5  }
 0x279 PF: > { %s3216_s10 = sld [smem:[#allocation15_spill]]  ;;  %s3217_s18 = sld [smem:[#allocation14_spill]] }
 0x27a   : > { %s3218_s19 = sld [smem:[#allocation16_spill]] }
 0x27f   : > { %p1711_p2 = scmp.ge.s32.totalorder %s3216_s10, 2  ;;  %s1481_s29 = sand.u32 1, %s3217_s18  }
 0x280   : > { %p3219_p4 = scmp.ne.s32.totalorder %s3218_s19, 0  ;;  %s1482_s23 = scalar_lea.sflag [#allocation4], %s1481_s29 }
 0x282   : > { %p1705_p6 = pnand %p1711_p2, %p3219_p4 }
 0x284   : > { %2035 = dma.done.wait (!%p1705_p6), %s1482_s23, 512  }
 0x285   : > { %2037 = vsyncadd (!%p1705_p6), %s1482_s23, 4294966784  ;;  %s24_s22 = sadd.s32 1, %s3216_s10   ;;  %s3220_s0 = sld [smem:[#allocation19_spill]] }
 0x286   : > { %p21_p0 = scmp.ge.s32.totalorder %s24_s22, 6   ;;  %s3221_s28 = sld [smem:[#allocation17_spill]] }
 0x287   : > { %s3222_s11 = sld [smem:[#allocation18_spill]]  ;;  %s3223_s15 = smov %s2044_s16 }
 0x288   : > { %s3224_s16 = smov %s2048_s17  ;;  %s3226_s18 = smov %s2060_s20 }
 0x289   : > { %s3227_s19 = smov %s2064_s21  ;;  %23 = sbr.rel (!%p21_p0) target bundleno = 14 (0xe), region = 108 }
 0x28b   : > { %s3225_s17 = smov %s3220_s0 }
 0x28c   : > { %s3228_s20 = smov %s3221_s28 }
 0x28d   : > { %s3229_s21 = smov %s3222_s11 }
 0x290   :  { %1487 = vsyncpa [#allocation3], 1 }
 0x291   :  { %1489 = vsyncpa [#allocation3 + $0x1], 1 }
 0x292   :  { %1490 = vsyncpa [#allocation7], 1 }
 0x293   :  { %1492 = vsyncpa [#allocation7 + $0x1], 1 }
 0x294   :  { %1493 = vsyncpa [#allocation4], 1 }
 0x295   :  { %1495 = vsyncpa [#allocation4 + $0x1], 1 }
 0x296   :  { %1496 = vsyncpa [#allocation5], 1 }
 0x297   :  { %1498 = vsyncpa [#allocation5 + $0x1], 1 }

</bundles_post_ra>
